<compile_context>
chip_gen: v7x
topology: tpu7x:2x2x1
jax: 0.10.0
libtpu: 0.0.40
codegen_flags: <defaults>
</compile_context>

<pallas_src>
import jax
import jax.numpy as jnp
from jax import lax
from jax.experimental import pallas as pl
from jax.experimental.pallas import tpu as pltpu


def _round_up(x: int, m: int) -> int:
    return ((x + m - 1) // m) * m


def _gated_recommender_kernel(
    audio_ref,    # (bt, Da)  f32
    text_ref,     # (bt, Dt)  f32
    wa_ref,       # (Da, E)
    ba_ref,       # (1, E)
    wt_ref,       # (Dt, E)
    btxt_ref,     # (1, E)
    wg1a_ref,     # (E, H)   top half of gate layer-1 weight (acts on pa)
    wg1b_ref,     # (E, H)   bottom half (acts on pt)
    bg1_ref,      # (1, H)
    wg2_ref,      # (1, H)   gate layer-2 weight, transposed
    bg2_ref,      # (1, 1)
    emb_ref,      # (bt, E)            out: L2-normalized embedding
    alpha_ref,    # (1, bt//128, 128)  out: alpha packed batch-into-lanes
):
    f32 = jnp.float32

    # Projections (MXU dots, f32 accumulate) + bias + ReLU.
    pa = jnp.dot(audio_ref[...], wa_ref[...], preferred_element_type=f32)
    pa = jnp.maximum(pa + ba_ref[...], 0.0)                      # (bt, E)
    pt = jnp.dot(text_ref[...], wt_ref[...], preferred_element_type=f32)
    pt = jnp.maximum(pt + btxt_ref[...], 0.0)                    # (bt, E)

    # Gate layer 1 on concat([pa, pt]) expressed as two dots (no concatenate).
    h = (jnp.dot(pa.astype(wg1a_ref.dtype), wg1a_ref[...], preferred_element_type=f32)
         + jnp.dot(pt.astype(wg1b_ref.dtype), wg1b_ref[...], preferred_element_type=f32))
    h = jnp.maximum(h + bg1_ref[...], 0.0)                       # (bt, H)
    # TODO(synk): training-mode Dropout(0.1) mask; eval-mode identity here.

    # Gate layer 2: N=1 matmul as VPU multiply + cross-lane reduce.
    logit = jnp.sum(h * wg2_ref[...], axis=-1, keepdims=True) + bg2_ref[...]
    alpha = jax.nn.sigmoid(logit)                                # (bt, 1)

    # Gated fusion: pt + alpha*(pa - pt)  ==  alpha*pa + (1-alpha)*pt.
    fused = pt + alpha * (pa - pt)                               # (bt, E)

    # F.normalize(p=2, dim=1, eps=1e-12): divide by max(||x||, 1e-12).
    sumsq = jnp.sum(fused * fused, axis=-1, keepdims=True)
    inv = lax.rsqrt(jnp.maximum(sumsq, 1e-24))                   # EUP rsqrt
    emb_ref[...] = (fused * inv).astype(emb_ref.dtype)

    # Pack alpha batch-into-lanes: (bt, 1) -> (1, bt//128, 128), lane c of row r
    # holds alpha[r*128 + c].  Built with broadcast + iota mask + sublane reduce
    # (all layout-trivial ops); lands on VPU/XLU slots that have slack and turns
    # the alpha store into a single unmasked, lane-dense vreg per 1024 rows.
    n = alpha.shape[0]
    rows = lax.broadcasted_iota(jnp.int32, (n, 128), 0)
    cols = lax.broadcasted_iota(jnp.int32, (n, 128), 1)
    sel = jnp.where((rows & 127) == cols,
                    jnp.broadcast_to(alpha, (n, 128)), 0.0)      # (bt, 128)
    packed = jnp.sum(sel.reshape(n // 128, 128, 128), axis=1)    # (bt//128, 128)
    alpha_ref[...] = packed.reshape(1, n // 128, 128).astype(alpha_ref.dtype)


def _choose_batch_tiling(B: int, batch_tile: int):
    """Pick (tile_b, num_tiles, B_pad): tile_b multiple of 128, >=2 grid steps
    when the batch allows (v7x has 2 TensorCores), minimal padding otherwise."""
    batch_tile = max(128, _round_up(int(batch_tile), 128))
    T = pl.cdiv(max(int(B), 1), 128)          # number of 128-row blocks needed
    Tmax = batch_tile // 128
    target = min(Tmax, max(1, pl.cdiv(T, 2)))  # cap blocks/tile; aim for >=2 tiles
    num_tiles = pl.cdiv(T, target)
    blocks_per_tile = pl.cdiv(T, num_tiles)    # rebalance -> small padding
    tile_b = 128 * blocks_per_tile
    return tile_b, num_tiles, num_tiles * tile_b


def pack_params(params, *, weight_dtype=jnp.float32):
    """One-time weight packing (hoisted out of the per-call path)."""
    E = params["ba"].shape[-1]
    H = params["bg1"].shape[-1]
    return dict(
        wa=params["wa"].astype(weight_dtype),
        ba=params["ba"].reshape(1, E).astype(jnp.float32),
        wt=params["wt"].astype(weight_dtype),
        bt=params["bt"].reshape(1, E).astype(jnp.float32),
        wg1a=params["wg1"][:E].astype(weight_dtype),
        wg1b=params["wg1"][E:].astype(weight_dtype),
        bg1=params["bg1"].reshape(1, H).astype(jnp.float32),
        wg2=params["wg2"].reshape(1, H).astype(jnp.float32),
        bg2=params["bg2"].reshape(1, 1).astype(jnp.float32),
    )


def gated_multimodal_recommender(audio_features, text_features, packed_params,
                                 *, batch_tile: int = 1024,
                                 out_dtype=jnp.float32):
    """Fused forward pass.  Returns (final_embedding (B,E), alpha (B,1))."""
    B, Da = audio_features.shape
    Dt = text_features.shape[1]
    E = packed_params["ba"].shape[-1]
    H = packed_params["bg1"].shape[-1]

    tile_b, num_tiles, B_pad = _choose_batch_tiling(B, batch_tile)

    audio = audio_features
    text = text_features
    if B_pad != B:                       # only the batch remainder is padded
        audio = jnp.pad(audio, ((0, B_pad - B), (0, 0)))
        text = jnp.pad(text, ((0, B_pad - B), (0, 0)))

    p = packed_params
    weights = (p["wa"], p["ba"], p["wt"], p["bt"],
               p["wg1a"], p["wg1b"], p["bg1"], p["wg2"], p["bg2"])

    def full_spec(a):
        nd = a.ndim
        return pl.BlockSpec(a.shape, lambda i, _n=nd: (0,) * _n)  # VMEM-resident

    in_specs = [
        pl.BlockSpec((tile_b, Da), lambda i: (i, 0)),
        pl.BlockSpec((tile_b, Dt), lambda i: (i, 0)),
    ] + [full_spec(w) for w in weights]

    R = tile_b // 128
    out_shape = (
        jax.ShapeDtypeStruct((B_pad, E), out_dtype),
        jax.ShapeDtypeStruct((num_tiles, R, 128), jnp.float32),
    )
    out_specs = (
        pl.BlockSpec((tile_b, E), lambda i: (i, 0)),
        pl.BlockSpec((1, R, 128), lambda i: (i, 0, 0)),
    )

    nbytes = lambda a: int(a.size) * a.dtype.itemsize
    # Right-sized VMEM limit: double-buffered activations/outputs + weights + headroom.
    est = (2 * tile_b * (Da + Dt) * audio.dtype.itemsize
           + 2 * tile_b * E * jnp.dtype(out_dtype).itemsize
           + 2 * tile_b * 4
           + 2 * sum(nbytes(w) for w in weights))
    vmem_limit = int(min(64 * 1024 * 1024,
                         max(16 * 1024 * 1024, est + 8 * 1024 * 1024)))

    flops = 2 * B_pad * (Da * E + Dt * E + 2 * E * H + H) + 10 * B_pad * E
    bytes_accessed = (nbytes(audio) + nbytes(text)
                      + sum(nbytes(w) for w in weights)
                      + B_pad * E * jnp.dtype(out_dtype).itemsize + B_pad * 4)
    cost = pl.CostEstimate(flops=int(flops), transcendentals=2 * B_pad,
                           bytes_accessed=int(bytes_accessed))

    emb_pad, alpha_pad = pl.pallas_call(
        _gated_recommender_kernel,
        out_shape=out_shape,
        grid=(num_tiles,),
        in_specs=in_specs,
        out_specs=out_specs,
        compiler_params=pltpu.CompilerParams(
            dimension_semantics=("parallel",),   # shards batch tiles across TCs on v7x
            vmem_limit_bytes=vmem_limit,
        ),
        cost_estimate=cost,
    )(audio, text, *weights)

    alpha = alpha_pad.reshape(B_pad, 1)[:B]
    return emb_pad[:B], alpha


def init_params(key, audio_input_dim, text_input_dim, embedding_dim, gate_hidden_dim):
    """torch.nn.Linear-style init (U[-1/sqrt(fan_in), 1/sqrt(fan_in)]).
    Weights stored as (in_features, out_features)."""
    def linear(k, fan_in, fan_out):
        kw, kb = jax.random.split(k)
        bound = 1.0 / jnp.sqrt(fan_in)
        w = jax.random.uniform(kw, (fan_in, fan_out), jnp.float32, -bound, bound)
        b = jax.random.uniform(kb, (1, fan_out), jnp.float32, -bound, bound)
        return w, b

    k_a, k_t, k_g1, k_g2 = jax.random.split(key, 4)
    wa, ba = linear(k_a, audio_input_dim, embedding_dim)
    wt, bt = linear(k_t, text_input_dim, embedding_dim)
    wg1, bg1 = linear(k_g1, 2 * embedding_dim, gate_hidden_dim)
    wg2, bg2 = linear(k_g2, gate_hidden_dim, 1)
    return dict(wa=wa, ba=ba, wt=wt, bt=bt, wg1=wg1, bg1=bg1, wg2=wg2, bg2=bg2)


def reference_forward(audio, text, params):
    """Pure-JAX f32 reference (mirrors the PyTorch module, eval mode)."""
    pa = jax.nn.relu(audio @ params["wa"] + params["ba"])
    pt = jax.nn.relu(text @ params["wt"] + params["bt"])
    cat = jnp.concatenate([pa, pt], axis=1)
    h = jax.nn.relu(cat @ params["wg1"] + params["bg1"])
    alpha = jax.nn.sigmoid(h @ params["wg2"] + params["bg2"])
    fused = alpha * pa + (1.0 - alpha) * pt
    norm = jnp.maximum(jnp.linalg.norm(fused, axis=1, keepdims=True), 1e-12)
    return fused / norm, alpha


if __name__ == "__main__":
    batch = 8
    audio_input_dim = 32
    text_input_dim = 48
    embedding_dim = 128
    gate_hidden_dim = 64

    key = jax.random.PRNGKey(0)
    k_params, k_audio, k_text = jax.random.split(key, 3)

    params = init_params(k_params, audio_input_dim, text_input_dim,
                         embedding_dim, gate_hidden_dim)
    packed = pack_params(params)   # one-time packing, hoisted out of the call path

    audio_features = jax.random.normal(k_audio, (batch, audio_input_dim), jnp.float32)
    text_features = jax.random.normal(k_text, (batch, text_input_dim), jnp.float32)

    final_embedding, alpha = gated_multimodal_recommender(
        audio_features, text_features, packed)
    jax.block_until_ready((final_embedding, alpha))

    assert final_embedding.shape == (batch, embedding_dim)
    assert alpha.shape == (batch, 1)

    ref_emb, ref_alpha = reference_forward(audio_features, text_features, params)
    emb_err = float(jnp.max(jnp.abs(final_embedding - ref_emb)))
    alpha_err = float(jnp.max(jnp.abs(alpha - ref_alpha)))
    assert emb_err < 2e-2 and alpha_err < 2e-2, (emb_err, alpha_err)

    print("KERNEL_OK")
</pallas_src>

<mosaic_0001>
module attributes {stable_mosaic.version = 11 : i64} {
  func.func @_gated_recommender_kernel(%arg0: i32, %arg1: memref<128x32xf32, #tpu.memory_space<vmem>>, %arg2: memref<128x48xf32, #tpu.memory_space<vmem>>, %arg3: memref<32x128xf32, #tpu.memory_space<vmem>>, %arg4: memref<1x128xf32, #tpu.memory_space<vmem>>, %arg5: memref<48x128xf32, #tpu.memory_space<vmem>>, %arg6: memref<1x128xf32, #tpu.memory_space<vmem>>, %arg7: memref<128x64xf32, #tpu.memory_space<vmem>>, %arg8: memref<128x64xf32, #tpu.memory_space<vmem>>, %arg9: memref<1x64xf32, #tpu.memory_space<vmem>>, %arg10: memref<1x64xf32, #tpu.memory_space<vmem>>, %arg11: memref<1x1xf32, #tpu.memory_space<vmem>>, %arg12: memref<128x128xf32, #tpu.memory_space<vmem>>, %arg13: memref<1x1x128xf32, #tpu.memory_space<vmem>>) attributes {dimension_semantics = [#tpu.dimension_semantics<parallel>], iteration_bounds = array<i64: 1>, scalar_prefetch = 0 : i64, scratch_operands = 0 : i64, tpu.core_type = #tpu.core_type<tc>, window_params = [{transform_indices = @transform_0, window_bounds = array<i64: 128, 32>}, {transform_indices = @transform_1, window_bounds = array<i64: 128, 48>}, {pipeline_mode = #tpu.pipeline_mode<synchronous>, transform_indices = @transform_2, window_bounds = array<i64: 32, 128>}, {pipeline_mode = #tpu.pipeline_mode<synchronous>, transform_indices = @transform_3, window_bounds = array<i64: 1, 128>}, {pipeline_mode = #tpu.pipeline_mode<synchronous>, transform_indices = @transform_4, window_bounds = array<i64: 48, 128>}, {pipeline_mode = #tpu.pipeline_mode<synchronous>, transform_indices = @transform_5, window_bounds = array<i64: 1, 128>}, {pipeline_mode = #tpu.pipeline_mode<synchronous>, transform_indices = @transform_6, window_bounds = array<i64: 128, 64>}, {pipeline_mode = #tpu.pipeline_mode<synchronous>, transform_indices = @transform_7, window_bounds = array<i64: 128, 64>}, {pipeline_mode = #tpu.pipeline_mode<synchronous>, transform_indices = @transform_8, window_bounds = array<i64: 1, 64>}, {pipeline_mode = #tpu.pipeline_mode<synchronous>, transform_indices = @transform_9, window_bounds = array<i64: 1, 64>}, {pipeline_mode = #tpu.pipeline_mode<synchronous>, transform_indices = @transform_10, window_bounds = array<i64: 1, 1>}, {transform_indices = @transform_11, window_bounds = array<i64: 128, 128>}, {transform_indices = @transform_12, window_bounds = array<i64: 1, 1, 128>}]} {
    %c0 = arith.constant 0 : index
    %c0_0 = arith.constant 0 : index
    %0 = vector.load %arg1[%c0, %c0_0] : memref<128x32xf32, #tpu.memory_space<vmem>>, vector<128x32xf32>
    %c0_1 = arith.constant 0 : index
    %c0_2 = arith.constant 0 : index
    %1 = vector.load %arg3[%c0_1, %c0_2] : memref<32x128xf32, #tpu.memory_space<vmem>>, vector<32x128xf32>
    %cst = arith.constant dense<0.000000e+00> : vector<128x128xf32>
    %2 = tpu.matmul %0, %1, %cst {dimension_numbers = #tpu.dot_dimension_numbers<[1], [0], [0], [1], [0, 0, 1, 1], [], []>} : vector<128x32xf32>, vector<32x128xf32>, vector<128x128xf32> -> vector<128x128xf32>
    %c0_3 = arith.constant 0 : index
    %c0_4 = arith.constant 0 : index
    %3 = vector.load %arg4[%c0_3, %c0_4] : memref<1x128xf32, #tpu.memory_space<vmem>>, vector<1x128xf32>
    %4 = vector.broadcast %3 : vector<1x128xf32> to vector<128x128xf32>
    %5 = arith.addf %2, %4 : vector<128x128xf32>
    %cst_5 = arith.constant 0.000000e+00 : f32
    %6 = vector.broadcast %cst_5 : f32 to vector<128x128xf32>
    %7 = arith.maximumf %5, %6 : vector<128x128xf32>
    %c0_6 = arith.constant 0 : index
    %c0_7 = arith.constant 0 : index
    %8 = vector.load %arg2[%c0_6, %c0_7] : memref<128x48xf32, #tpu.memory_space<vmem>>, vector<128x48xf32>
    %c0_8 = arith.constant 0 : index
    %c0_9 = arith.constant 0 : index
    %9 = vector.load %arg5[%c0_8, %c0_9] : memref<48x128xf32, #tpu.memory_space<vmem>>, vector<48x128xf32>
    %cst_10 = arith.constant dense<0.000000e+00> : vector<128x128xf32>
    %10 = tpu.matmul %8, %9, %cst_10 {dimension_numbers = #tpu.dot_dimension_numbers<[1], [0], [0], [1], [0, 0, 1, 1], [], []>} : vector<128x48xf32>, vector<48x128xf32>, vector<128x128xf32> -> vector<128x128xf32>
    %c0_11 = arith.constant 0 : index
    %c0_12 = arith.constant 0 : index
    %11 = vector.load %arg6[%c0_11, %c0_12] : memref<1x128xf32, #tpu.memory_space<vmem>>, vector<1x128xf32>
    %12 = vector.broadcast %11 : vector<1x128xf32> to vector<128x128xf32>
    %13 = arith.addf %10, %12 : vector<128x128xf32>
    %cst_13 = arith.constant 0.000000e+00 : f32
    %14 = vector.broadcast %cst_13 : f32 to vector<128x128xf32>
    %15 = arith.maximumf %13, %14 : vector<128x128xf32>
    %c0_14 = arith.constant 0 : index
    %c0_15 = arith.constant 0 : index
    %16 = vector.load %arg7[%c0_14, %c0_15] : memref<128x64xf32, #tpu.memory_space<vmem>>, vector<128x64xf32>
    %cst_16 = arith.constant dense<0.000000e+00> : vector<128x64xf32>
    %17 = tpu.matmul %7, %16, %cst_16 {dimension_numbers = #tpu.dot_dimension_numbers<[1], [0], [0], [1], [0, 0, 1, 1], [], []>} : vector<128x128xf32>, vector<128x64xf32>, vector<128x64xf32> -> vector<128x64xf32>
    %c0_17 = arith.constant 0 : index
    %c0_18 = arith.constant 0 : index
    %18 = vector.load %arg8[%c0_17, %c0_18] : memref<128x64xf32, #tpu.memory_space<vmem>>, vector<128x64xf32>
    %cst_19 = arith.constant dense<0.000000e+00> : vector<128x64xf32>
    %19 = tpu.matmul %15, %18, %cst_19 {dimension_numbers = #tpu.dot_dimension_numbers<[1], [0], [0], [1], [0, 0, 1, 1], [], []>} : vector<128x128xf32>, vector<128x64xf32>, vector<128x64xf32> -> vector<128x64xf32>
    %20 = arith.addf %17, %19 : vector<128x64xf32>
    %c0_20 = arith.constant 0 : index
    %c0_21 = arith.constant 0 : index
    %21 = vector.load %arg9[%c0_20, %c0_21] : memref<1x64xf32, #tpu.memory_space<vmem>>, vector<1x64xf32>
    %22 = vector.broadcast %21 : vector<1x64xf32> to vector<128x64xf32>
    %23 = arith.addf %20, %22 : vector<128x64xf32>
    %cst_22 = arith.constant 0.000000e+00 : f32
    %24 = vector.broadcast %cst_22 : f32 to vector<128x64xf32>
    %25 = arith.maximumf %23, %24 : vector<128x64xf32>
    %c0_23 = arith.constant 0 : index
    %c0_24 = arith.constant 0 : index
    %26 = vector.load %arg10[%c0_23, %c0_24] : memref<1x64xf32, #tpu.memory_space<vmem>>, vector<1x64xf32>
    %27 = vector.broadcast %26 : vector<1x64xf32> to vector<128x64xf32>
    %28 = arith.mulf %25, %27 : vector<128x64xf32>
    %cst_25 = arith.constant dense<0.000000e+00> : vector<128xf32>
    %29 = vector.multi_reduction <add>, %28, %cst_25 [1] : vector<128x64xf32> to vector<128xf32>
    %30 = vector.shape_cast %29 : vector<128xf32> to vector<128x1xf32>
    %c0_26 = arith.constant 0 : index
    %c0_27 = arith.constant 0 : index
    %31 = vector.load %arg11[%c0_26, %c0_27] : memref<1x1xf32, #tpu.memory_space<vmem>>, vector<1x1xf32>
    %32 = vector.broadcast %31 : vector<1x1xf32> to vector<128x1xf32>
    %33 = arith.addf %30, %32 : vector<128x1xf32>
    %34 = arith.negf %33 : vector<128x1xf32>
    %35 = math.exp %34 : vector<128x1xf32>
    %cst_28 = arith.constant 1.000000e+00 : f32
    %36 = vector.broadcast %cst_28 : f32 to vector<128x1xf32>
    %37 = arith.addf %36, %35 : vector<128x1xf32>
    %38 = arith.divf %36, %37 : vector<128x1xf32>
    %39 = arith.subf %7, %15 : vector<128x128xf32>
    %40 = vector.broadcast %38 : vector<128x1xf32> to vector<128x128xf32>
    %41 = arith.mulf %40, %39 : vector<128x128xf32>
    %42 = arith.addf %15, %41 : vector<128x128xf32>
    %43 = arith.mulf %42, %42 : vector<128x128xf32>
    %cst_29 = arith.constant dense<0.000000e+00> : vector<128xf32>
    %44 = vector.multi_reduction <add>, %43, %cst_29 [1] : vector<128x128xf32> to vector<128xf32>
    %45 = vector.shape_cast %44 : vector<128xf32> to vector<128x1xf32>
    %cst_30 = arith.constant 1.000000e-24 : f32
    %46 = vector.broadcast %cst_30 : f32 to vector<128x1xf32>
    %47 = arith.maximumf %45, %46 : vector<128x1xf32>
    %48 = math.rsqrt %47 : vector<128x1xf32>
    %49 = vector.broadcast %48 : vector<128x1xf32> to vector<128x128xf32>
    %50 = arith.mulf %42, %49 : vector<128x128xf32>
    %c0_31 = arith.constant 0 : index
    %c0_32 = arith.constant 0 : index
    %51 = vector.load %arg12[%c0_31, %c0_32] : memref<128x128xf32, #tpu.memory_space<vmem>>, vector<128x128xf32>
    tpu.vector_store %arg12[%c0_31, %c0_32], %50 {strides = array<i32>} : memref<128x128xf32, #tpu.memory_space<vmem>>, vector<128x128xf32>,
    %52 = tpu.iota {dimensions = array<i32: 0>} : vector<128x128xi32>
    %53 = tpu.iota {dimensions = array<i32: 1>} : vector<128x128xi32>
    %c127_i32 = arith.constant 127 : i32
    %54 = vector.broadcast %c127_i32 : i32 to vector<128x128xi32>
    %55 = arith.andi %52, %54 : vector<128x128xi32>
    %56 = arith.cmpi eq, %55, %53 : vector<128x128xi32>
    %57 = vector.shape_cast %38 : vector<128x1xf32> to vector<128x1xf32>
    %58 = vector.broadcast %57 : vector<128x1xf32> to vector<128x128xf32>
    %cst_33 = arith.constant 0.000000e+00 : f32
    %59 = vector.broadcast %cst_33 : f32 to vector<128x128xf32>
    %60 = arith.select %56, %58, %59 : vector<128x128xi1>, vector<128x128xf32>
    %61 = vector.shape_cast %60 : vector<128x128xf32> to vector<1x128x128xf32>
    %cst_34 = arith.constant dense<0.000000e+00> : vector<1x128xf32>
    %62 = vector.multi_reduction <add>, %61, %cst_34 [1] : vector<1x128x128xf32> to vector<1x128xf32>
    %63 = vector.shape_cast %62 : vector<1x128xf32> to vector<1x1x128xf32>
    %c0_35 = arith.constant 0 : index
    %c0_36 = arith.constant 0 : index
    %c0_37 = arith.constant 0 : index
    %64 = vector.load %arg13[%c0_35, %c0_36, %c0_37] : memref<1x1x128xf32, #tpu.memory_space<vmem>>, vector<1x1x128xf32>
    tpu.vector_store %arg13[%c0_35, %c0_36, %c0_37], %63 {strides = array<i32>} : memref<1x1x128xf32, #tpu.memory_space<vmem>>, vector<1x1x128xf32>,
    return
  }
  func.func @transform_0(%arg0: i32) -> (i32, i32) {
    %c0_i32 = arith.constant 0 : i32
    %c0_i32_0 = arith.constant 0 : i32
    return %arg0, %c0_i32 : i32, i32
  }
  func.func @transform_1(%arg0: i32) -> (i32, i32) {
    %c0_i32 = arith.constant 0 : i32
    %c0_i32_0 = arith.constant 0 : i32
    return %arg0, %c0_i32 : i32, i32
  }
  func.func @transform_2(%arg0: i32) -> (i32, i32) {
    %c0_i32 = arith.constant 0 : i32
    %c0_i32_0 = arith.constant 0 : i32
    %c0_i32_1 = arith.constant 0 : i32
    return %c0_i32, %c0_i32_0 : i32, i32
  }
  func.func @transform_3(%arg0: i32) -> (i32, i32) {
    %c0_i32 = arith.constant 0 : i32
    %c0_i32_0 = arith.constant 0 : i32
    %c0_i32_1 = arith.constant 0 : i32
    return %c0_i32, %c0_i32_0 : i32, i32
  }
  func.func @transform_4(%arg0: i32) -> (i32, i32) {
    %c0_i32 = arith.constant 0 : i32
    %c0_i32_0 = arith.constant 0 : i32
    %c0_i32_1 = arith.constant 0 : i32
    return %c0_i32, %c0_i32_0 : i32, i32
  }
  func.func @transform_5(%arg0: i32) -> (i32, i32) {
    %c0_i32 = arith.constant 0 : i32
    %c0_i32_0 = arith.constant 0 : i32
    %c0_i32_1 = arith.constant 0 : i32
    return %c0_i32, %c0_i32_0 : i32, i32
  }
  func.func @transform_6(%arg0: i32) -> (i32, i32) {
    %c0_i32 = arith.constant 0 : i32
    %c0_i32_0 = arith.constant 0 : i32
    %c0_i32_1 = arith.constant 0 : i32
    return %c0_i32, %c0_i32_0 : i32, i32
  }
  func.func @transform_7(%arg0: i32) -> (i32, i32) {
    %c0_i32 = arith.constant 0 : i32
    %c0_i32_0 = arith.constant 0 : i32
    %c0_i32_1 = arith.constant 0 : i32
    return %c0_i32, %c0_i32_0 : i32, i32
  }
  func.func @transform_8(%arg0: i32) -> (i32, i32) {
    %c0_i32 = arith.constant 0 : i32
    %c0_i32_0 = arith.constant 0 : i32
    %c0_i32_1 = arith.constant 0 : i32
    return %c0_i32, %c0_i32_0 : i32, i32
  }
  func.func @transform_9(%arg0: i32) -> (i32, i32) {
    %c0_i32 = arith.constant 0 : i32
    %c0_i32_0 = arith.constant 0 : i32
    %c0_i32_1 = arith.constant 0 : i32
    return %c0_i32, %c0_i32_0 : i32, i32
  }
  func.func @transform_10(%arg0: i32) -> (i32, i32) {
    %c0_i32 = arith.constant 0 : i32
    %c0_i32_0 = arith.constant 0 : i32
    %c0_i32_1 = arith.constant 0 : i32
    return %c0_i32, %c0_i32_0 : i32, i32
  }
  func.func @transform_11(%arg0: i32) -> (i32, i32) {
    %c0_i32 = arith.constant 0 : i32
    %c0_i32_0 = arith.constant 0 : i32
    return %arg0, %c0_i32 : i32, i32
  }
  func.func @transform_12(%arg0: i32) -> (i32, i32, i32) {
    %c0_i32 = arith.constant 0 : i32
    %c0_i32_0 = arith.constant 0 : i32
    %c0_i32_1 = arith.constant 0 : i32
    return %arg0, %c0_i32, %c0_i32_0 : i32, i32, i32
  }
}

</mosaic_0001>

<bundles_post_ra>
// kernel: tpu_custom_call.1
= control target key start
LH: loop header
LB: loop body
LE: loop exit
PB: predicated region body
PF: predicated region fallthrough
CT: control target
= control target key end

     0   :  { %s2876_s0 = inlined_call_operand.vmem [shape: f32[128,32], index: 0, kind: input, shape index: {}]   ;;  %s2877_s1 = inlined_call_operand.vmem [shape: f32[128,48], index: 1, kind: input, shape index: {}]   ;;  %s2878_s2 = inlined_call_operand.vmem [shape: f32[32,128], index: 2, kind: input, shape index: {}]   ;;  %s2879_s3 = inlined_call_operand.vmem [shape: f32[1,128], index: 3, kind: input, shape index: {}]   ;;  %s2880_s4 = inlined_call_operand.vmem [shape: f32[48,128], index: 4, kind: input, shape index: {}]   ;;  %s2881_s5 = inlined_call_operand.vmem [shape: f32[1,128], index: 5, kind: input, shape index: {}]   ;;  %s2882_s6 = inlined_call_operand.vmem [shape: f32[128,64], index: 6, kind: input, shape index: {}]   ;;  %s2883_s7 = inlined_call_operand.vmem [shape: f32[128,64], index: 7, kind: input, shape index: {}]   ;;  %s2884_s8 = inlined_call_operand.vmem [shape: f32[1,64], index: 8, kind: input, shape index: {}]   ;;  %s2885_s9 = inlined_call_operand.vmem [shape: f32[1,64], index: 9, kind: input, shape index: {}]   ;;  %s2886_s10 = inlined_call_operand.<no memory space> [shape: f32[1,1], index: 10, kind: input, shape index: {}]   ;;  %s2887_s11 = inlined_call_operand.hbm [shape: f32[128,128], index: 11, kind: output, shape index: {0}]   ;;  %s2888_s12 = inlined_call_operand.hbm [shape: f32[1,1,128], index: 12, kind: output, shape index: {1}]  }
   0x1   :  { %v18_v0 = vstv %s2886_s10 }
   0x2   :  { %19 = vst [vmem:[#allocation2] sm:$0x1] %v18_v0 }
   0x3   :  { %20 = vsyncpa [#allocation4], 0  ;;  %v297_v1 = vld [vmem:[%s2880_s4] sm:$0xff]  ;;  %v298_v2 = vld [vmem:[%s2880_s4 + $0x8] sm:$0xff]  ;;  %vm71_vm0 = vcmask 261120   ;;  %vm310_vm1 = vcmask 392192  }
   0x4   :  { %v60_v3 = vld [vmem:[%s2878_s2] sm:$0xff]  ;;  %v1778_v4 = vpack.c.bf16 %v298_v2, %v297_v1  ;;  %v61_v5 = vld [vmem:[%s2878_s2 + $0x8] sm:$0xff]  ;;  %v299_v6 = vld [vmem:[%s2880_s4 + $0x10] sm:$0xff] }
   0x5   :  { %v300_v7 = vld [vmem:[%s2880_s4 + $0x18] sm:$0xff]  ;;  %v1770_v8 = vpack.c.bf16 %v61_v5, %v60_v3  ;;  %v62_v10 = vld [vmem:[%s2878_s2 + $0x10] sm:$0xff]  ;;  %v44_v12 = vld [vmem:[%s2876_s0] sm:$0xff] }
   0x6   :  { %v1782_v9 = vpack.c.bf16 %v300_v7, %v299_v6  ;;  %v63_v11 = vld [vmem:[%s2878_s2 + $0x18] sm:$0xff]  ;;  %1779 = vmatprep.subr.bf16.mxu1 %v1778_v4  ;;  %1598 = vmatprep.mubr.msk.f32.mxu0 %vm71_vm0, %v44_v12  ;;  %v301_v14 = vld [vmem:[%s2880_s4 + $0x20] sm:$0xff]  ;;  %v302_v15 = vld [vmem:[%s2880_s4 + $0x28] sm:$0xff] }
   0x7   :  { %v1774_v13 = vpack.c.bf16 %v63_v11, %v62_v10  ;;  %1771 = vmatprep.subr.bf16.mxu0 %v1770_v8  ;;  %1781 = vmatpush3.bf16.msra.mxu1 %v1778_v4  ;;  %v281_v16 = vld [vmem:[%s2877_s1] sm:$0xff]  ;;  %v1786_v17 = vpack.c.bf16 %v302_v15, %v301_v14  ;;  %v45_v18 = vld [vmem:[%s2876_s0 + $0x8] sm:$0xff]  ;;  %v46_v19 = vld [vmem:[%s2876_s0 + $0x10] sm:$0xff] }
   0x8   :  { %1773 = vmatpush3.bf16.msra.mxu0 %v1770_v8  ;;  %1783 = vmatprep.subr.bf16.mxu1 %v1782_v9  ;;  %v282_v20 = vld [vmem:[%s2877_s1 + $0x8] sm:$0xff]  ;;  %v47_v21 = vld [vmem:[%s2876_s0 + $0x18] sm:$0xff]  ;;  %v283_v22 = vld [vmem:[%s2877_s1 + $0x10] sm:$0xff] }
   0x9   :  { %1775 = vmatprep.subr.bf16.mxu0 %v1774_v13  ;;  %1634 = vmatprep.mubr.msk.f32.mxu1 %vm310_vm1, %v281_v16  ;;  %v48_v23 = vld [vmem:[%s2876_s0 + $0x20] sm:$0xff]  ;;  %v284_v24 = vld [vmem:[%s2877_s1 + $0x18] sm:$0xff]  ;;  %v521_v26 = vld [vmem:[%s2882_s6 + $0x8] sm:$0xff] }
   0xa   :  { %v520_v25 = vld [vmem:[%s2882_s6] sm:$0xff]  ;;  %v537_v29 = vld [vmem:[%s2883_s7 + $0x8] sm:$0xff]  ;;  %v522_v30 = vld [vmem:[%s2882_s6 + $0x10] sm:$0xff] }
   0xb   :  { %1785 = vmatpush3.bf16.msra.mxu1 %v1782_v9  ;;  %v536_v27 = vld [vmem:[%s2883_s7] sm:$0xff]  ;;  %v1822_v28 = vpack.c.bf16 %v521_v26, %v520_v25  ;;  %v523_v31 = vld [vmem:[%s2882_s6 + $0x18] sm:$0xff]  ;;  %v538_v34 = vld [vmem:[%s2883_s7 + $0x10] sm:$0xff] }
   0xc   :  { %1777 = vmatpush3.bf16.msra.mxu0 %v1774_v13  ;;  %1787 = vmatprep.subr.bf16.mxu1 %v1786_v17  ;;  %v1790_v32 = vpack.c.bf16 %v537_v29, %v536_v27  ;;  %v1826_v33 = vpack.c.bf16 %v523_v31, %v522_v30  ;;  %v539_v35 = vld [vmem:[%s2883_s7 + $0x18] sm:$0xff]  ;;  %v524_v36 = vld [vmem:[%s2882_s6 + $0x20] sm:$0xff]  ;;  %v49_v38 = vld [vmem:[%s2876_s0 + $0x28] sm:$0xff] }
   0xd   :  { %v285_v37 = vld [vmem:[%s2877_s1 + $0x20] sm:$0xff]  ;;  %1823 = vmatprep.subr.bf16.mxu0 %v1822_v28  ;;  %v525_v39 = vld [vmem:[%s2882_s6 + $0x28] sm:$0xff]  ;;  %v50_v40 = vld [vmem:[%s2876_s0 + $0x30] sm:$0xff]  ;;  %v1794_v41 = vpack.c.bf16 %v539_v35, %v538_v34 }
   0xe   :  { %v1830_v42 = vpack.c.bf16 %v525_v39, %v524_v36  ;;  %v540_v43 = vld [vmem:[%s2883_s7 + $0x20] sm:$0xff]  ;;  %v541_v44 = vld [vmem:[%s2883_s7 + $0x28] sm:$0xff]  ;;  %v526_v46 = vld [vmem:[%s2882_s6 + $0x30] sm:$0xff] }
   0xf   :  { %1599 = vmatmul.mubr.msk.f32.vlgmr.msra.gmra.mrb[0].mxu0 %vm71_vm0, %v45_v18  ;;  %1789 = vmatpush3.bf16.msra.mxu1 %v1786_v17  ;;  %v286_v45 = vld [vmem:[%s2877_s1 + $0x28] sm:$0xff]  ;;  %v527_v47 = vld [vmem:[%s2882_s6 + $0x38] sm:$0xff]  ;;  %v287_v48 = vld [vmem:[%s2877_s1 + $0x30] sm:$0xff]  ;;  %v1798_v51 = vpack.c.bf16 %v541_v44, %v540_v43 }
  0x10   :  { %1601 = vmatprep.mubr.msk.f32.mxu0 %vm71_vm0, %v46_v19  ;;  %1825 = vmatpush3.bf16.msra.mxu0 %v1822_v28  ;;  %v51_v49 = vld [vmem:[%s2876_s0 + $0x38] sm:$0xff]  ;;  %v52_v50 = vld [vmem:[%s2876_s0 + $0x40] sm:$0xff] }
  0x11   :  { %1791 = vmatprep.subr.bf16.mxu1 %v1790_v32  ;;  %1827 = vmatprep.subr.bf16.mxu0 %v1826_v33 }
  0x12   :  { %1635 = vmatmul.mubr.msk.f32.vlgmr.msra.gmra.mrb[0].mxu1 %vm310_vm1, %v282_v20 }
  0x13   :  { %1602 = vmatmul.mubr.msk.f32.gmra.mrb[2].mxu0 %vm71_vm0, %v47_v21  ;;  %1637 = vmatprep.mubr.msk.f32.mxu1 %vm310_vm1, %v283_v22 }
  0x14   :  { %1604 = vmatprep.mubr.msk.f32.mxu0 %vm71_vm0, %v48_v23  ;;  %1793 = vmatpush3.bf16.msra.mxu1 %v1790_v32 }
  0x15   :  { %1829 = vmatpush3.bf16.msra.mxu0 %v1826_v33  ;;  %1795 = vmatprep.subr.bf16.mxu1 %v1794_v41 }
  0x16   :  { %1638 = vmatmul.mubr.msk.f32.gmra.mrb[2].mxu1 %vm310_vm1, %v284_v24 }
  0x17   :  { %1640 = vmatprep.mubr.msk.f32.mxu1 %vm310_vm1, %v285_v37  ;;  %1605 = vmatmul.mubr.msk.f32.gmra.mrb[4].mxu0 %vm71_vm0, %v49_v38 }
  0x18   :  { %1607 = vmatprep.mubr.msk.f32.mxu0 %vm71_vm0, %v50_v40 }
  0x19   :  { %21 = vsyncpa [#allocation6], 0  ;;  %1831 = vmatprep.subr.bf16.mxu0 %v1830_v42  ;;  %v1834_v52 = vpack.c.bf16 %v527_v47, %v526_v46  ;;  %v542_v53 = vld [vmem:[%s2883_s7 + $0x30] sm:$0xff]  ;;  %v543_v54 = vld [vmem:[%s2883_s7 + $0x38] sm:$0xff]  ;;  %1797 = vmatpush3.bf16.msra.mxu1 %v1794_v41  ;;  %vm904_vm2 = vcmask 523264  }
  0x1a   :  { %1641 = vmatmul.mubr.msk.f32.gmra.mrb[4].mxu1 %vm310_vm1, %v286_v45  ;;  %v288_v55 = vld [vmem:[%s2877_s1 + $0x38] sm:$0xff]  ;;  %v528_v56 = vld [vmem:[%s2882_s6 + $0x40] sm:$0xff]  ;;  %v529_v57 = vld [vmem:[%s2882_s6 + $0x48] sm:$0xff]  ;;  %1833 = vmatpush3.bf16.msra.mxu0 %v1830_v42  ;;  %v1802_v61 = vpack.c.bf16 %v543_v54, %v542_v53 }
  0x1b   :  { %1643 = vmatprep.mubr.msk.f32.mxu1 %vm310_vm1, %v287_v48  ;;  %1608 = vmatmul.mubr.msk.f32.gmra.mrb[6].mxu0 %vm71_vm0, %v51_v49  ;;  %v289_v58 = vld [vmem:[%s2877_s1 + $0x40] sm:$0xff]  ;;  %v53_v59 = vld [vmem:[%s2876_s0 + $0x48] sm:$0xff]  ;;  %v54_v60 = vld [vmem:[%s2876_s0 + $0x50] sm:$0xff]  ;;  %v1838_v62 = vpack.c.bf16 %v529_v57, %v528_v56 }
  0x1c   :  { %1610 = vmatprep.mubr.msk.f32.mxu0 %vm71_vm0, %v52_v50  ;;  %1799 = vmatprep.subr.bf16.mxu1 %v1798_v51  ;;  %v544_v63 = vld [vmem:[%s2883_s7 + $0x40] sm:$0xff]  ;;  %v545_v0 = vld [vmem:[%s2883_s7 + $0x48] sm:$0xff]  ;;  %v530_v2 = vld [vmem:[%s2882_s6 + $0x50] sm:$0xff] }
  0x1d   :  { %1835 = vmatprep.subr.bf16.mxu0 %v1834_v52  ;;  %v290_v1 = vld [vmem:[%s2877_s1 + $0x48] sm:$0xff]  ;;  %v531_v3 = vld [vmem:[%s2882_s6 + $0x58] sm:$0xff]  ;;  %v291_v4 = vld [vmem:[%s2877_s1 + $0x50] sm:$0xff]  ;;  %1801 = vmatpush3.bf16.msra.mxu1 %v1798_v51  ;;  %v1806_v7 = vpack.c.bf16 %v545_v0, %v544_v63 }
  0x1e   :  { %1644 = vmatmul.mubr.msk.f32.gmra.mrb[6].mxu1 %vm310_vm1, %v288_v55  ;;  %v55_v5 = vld [vmem:[%s2876_s0 + $0x58] sm:$0xff]  ;;  %v56_v6 = vld [vmem:[%s2876_s0 + $0x60] sm:$0xff]  ;;  %1837 = vmatpush3.bf16.msra.mxu0 %v1834_v52  ;;  %v1842_v8 = vpack.c.bf16 %v531_v3, %v530_v2  ;;  %v546_v9 = vld [vmem:[%s2883_s7 + $0x50] sm:$0xff] }
  0x1f   :  { %1646 = vmatprep.mubr.msk.f32.mxu1 %vm310_vm1, %v289_v58  ;;  %1611 = vmatmul.mubr.msk.f32.gmra.mrb[8].mxu0 %vm71_vm0, %v53_v59  ;;  %v547_v10 = vld [vmem:[%s2883_s7 + $0x58] sm:$0xff]  ;;  %v532_v12 = vld [vmem:[%s2882_s6 + $0x60] sm:$0xff]  ;;  %v533_v13 = vld [vmem:[%s2882_s6 + $0x68] sm:$0xff] }
  0x20   :  { %1613 = vmatprep.mubr.msk.f32.mxu0 %vm71_vm0, %v54_v60  ;;  %1803 = vmatprep.subr.bf16.mxu1 %v1802_v61  ;;  %v292_v11 = vld [vmem:[%s2877_s1 + $0x58] sm:$0xff]  ;;  %v293_v14 = vld [vmem:[%s2877_s1 + $0x60] sm:$0xff]  ;;  %v57_v15 = vld [vmem:[%s2876_s0 + $0x68] sm:$0xff]  ;;  %v1810_v17 = vpack.c.bf16 %v547_v10, %v546_v9  ;;  %v1846_v18 = vpack.c.bf16 %v533_v13, %v532_v12 }
  0x21   :  { %1839 = vmatprep.subr.bf16.mxu0 %v1838_v62  ;;  %1805 = vmatpush3.bf16.msra.mxu1 %v1802_v61  ;;  %v58_v16 = vld [vmem:[%s2876_s0 + $0x70] sm:$0xff]  ;;  %v294_v19 = vld [vmem:[%s2877_s1 + $0x68] sm:$0xff]  ;;  %v59_v21 = vld [vmem:[%s2876_s0 + $0x78] sm:$0xff] }
  0x22   :  { %1647 = vmatmul.mubr.msk.f32.gmra.mrb[8].mxu1 %vm310_vm1, %v290_v1  ;;  %1841 = vmatpush3.bf16.msra.mxu0 %v1838_v62  ;;  %v295_v20 = vld [vmem:[%s2877_s1 + $0x70] sm:$0xff]  ;;  %v296_v22 = vld [vmem:[%s2877_s1 + $0x78] sm:$0xff]  ;;  %v548_v23 = vld [vmem:[%s2883_s7 + $0x60] sm:$0xff] }
  0x23   :  { %1649 = vmatprep.mubr.msk.f32.mxu1 %vm310_vm1, %v291_v4  ;;  %1614 = vmatmul.mubr.msk.f32.gmra.mrb[10].mxu0 %vm71_vm0, %v55_v5  ;;  %v549_v24 = vld [vmem:[%s2883_s7 + $0x68] sm:$0xff]  ;;  %v534_v26 = vld [vmem:[%s2882_s6 + $0x70] sm:$0xff]  ;;  %v535_v27 = vld [vmem:[%s2882_s6 + $0x78] sm:$0xff] }
  0x24   :  { %1616 = vmatprep.mubr.msk.f32.mxu0 %vm71_vm0, %v56_v6  ;;  %1807 = vmatprep.subr.bf16.mxu1 %v1806_v7  ;;  %v1814_v25 = vpack.c.bf16 %v549_v24, %v548_v23  ;;  %v1850_v28 = vpack.c.bf16 %v535_v27, %v534_v26  ;;  %v550_v29 = vld [vmem:[%s2883_s7 + $0x70] sm:$0xff]  ;;  %v551_v30 = vld [vmem:[%s2883_s7 + $0x78] sm:$0xff]  ;;  %v2351_v32 = vld [vmem:[%s2879_s3] ss:$0 sm:$0xff] }
  0x25   :  { %1843 = vmatprep.subr.bf16.mxu0 %v1842_v8  ;;  %1809 = vmatpush3.bf16.msra.mxu1 %v1806_v7  ;;  %v1818_v31 = vpack.c.bf16 %v551_v30, %v550_v29  ;;  %v2359_v36 = vld [vmem:[%s2881_s5] ss:$0 sm:$0xff] }
  0x26   :  { %1650 = vmatmul.mubr.msk.f32.gmra.mrb[10].mxu1 %vm310_vm1, %v292_v11  ;;  %1845 = vmatpush3.bf16.msra.mxu0 %v1842_v8 }
  0x27   :  { %1652 = vmatprep.mubr.msk.f32.mxu1 %vm310_vm1, %v293_v14  ;;  %1617 = vmatmul.mubr.msk.f32.gmra.mrb[12].mxu0 %vm71_vm0, %v57_v15 }
  0x28   :  { %1619 = vmatprep.mubr.msk.f32.mxu0 %vm71_vm0, %v58_v16  ;;  %1811 = vmatprep.subr.bf16.mxu1 %v1810_v17 }
  0x29   :  { %1847 = vmatprep.subr.bf16.mxu0 %v1846_v18  ;;  %1813 = vmatpush3.bf16.msra.mxu1 %v1810_v17 }
  0x2a   :  { %1653 = vmatmul.mubr.msk.f32.gmra.mrb[12].mxu1 %vm310_vm1, %v294_v19  ;;  %1849 = vmatpush3.bf16.msra.mxu0 %v1846_v18 }
  0x2b   :  { %1655 = vmatprep.mubr.msk.f32.mxu1 %vm310_vm1, %v295_v20  ;;  %1620 = vmatmul.mubr.msk.f32.gmra.mrb[14].mxu0 %vm71_vm0, %v59_v21 }
  0x2c   :  { %1815 = vmatprep.subr.bf16.mxu1 %v1814_v25  ;;  %1851 = vmatprep.subr.bf16.mxu0 %v1850_v28 }
  0x2d   :  { %1817 = vmatpush3.bf16.msra.mxu1 %v1814_v25 }
  0x2e   :  { %1656 = vmatmul.mubr.msk.f32.gmra.mrb[14].mxu1 %vm310_vm1, %v296_v22  ;;  %1853 = vmatpush3.bf16.msra.mxu0 %v1850_v28 }
  0x2f   :  { %1819 = vmatprep.subr.bf16.mxu1 %v1818_v31 }
  0x31   :  { %1821 = vmatpush3.bf16.msra.mxu1 %v1818_v31 }
  0xe2   :  { %v1600_v33 = vpop.f32.mrb[0].mxu0 }
  0xe3   :  { %v2354_v34 = vadd.f32 %v1600_v33, %v2351_v32  ;;  %v186_v35 = vpop.f32.mrb[1].mxu0 }
  0xe4   :  { %v2362_v37 = vadd.f32 %v2351_v32, %v186_v35 }
  0xe5   :  { %v266_v38 = vmax.f32 %v2354_v34, 0.0  ;;  %v1636_v39 = vpop.f32.mrb[0].mxu1 }
  0xe6   :  { %v265_v40 = vmax.f32 %v2362_v37, 0.0  ;;  %v431_v41 = vadd.f32 %v1636_v39, %v2359_v36  ;;  %v1603_v42 = vpop.f32.mrb[2].mxu0  ;;  %v425_v43 = vpop.f32.mrb[1].mxu1 }
  0xe7   :  { %v2368_v44 = vadd.f32 %v1603_v42, %v2351_v32  ;;  %v426_v45 = vadd.f32 %v2359_v36, %v425_v43  ;;  %v196_v46 = vpop.f32.mrb[3].mxu0 }
  0xe8   :  { %v2372_v47 = vadd.f32 %v2351_v32, %v196_v46  ;;  %1746 = vmatprep.mubr.f32.mxu0 %v265_v40  ;;  %v2381_v51 = vmax.f32 %v431_v41, 0.0 }
  0xe9   :  { %v268_v48 = vmax.f32 %v2368_v44, 0.0  ;;  %v2377_v49 = vmax.f32 %v426_v45, 0.0  ;;  %v1639_v50 = vpop.f32.mrb[2].mxu1  ;;  %1747 = vmatmul.mubr.f32.vlgmr.msra.gmra.mrb[16].mxu0 %v266_v38 }
  0xea   :  { %v267_v52 = vmax.f32 %v2372_v47, 0.0  ;;  %v441_v53 = vadd.f32 %v1639_v50, %v2359_v36  ;;  %v435_v54 = vpop.f32.mrb[3].mxu1  ;;  %v1606_v55 = vpop.f32.mrb[4].mxu0 }
  0xeb   :  { %v436_v56 = vadd.f32 %v2359_v36, %v435_v54  ;;  %1690 = vmatprep.mubr.f32.mxu1 %v2377_v49  ;;  %v2388_v57 = vadd.f32 %v1606_v55, %v2351_v32  ;;  %v206_v58 = vpop.f32.mrb[5].mxu0 }
  0xec   :  { %1691 = vmatmul.mubr.f32.vlgmr.msra.gmra.mrb[16].mxu1 %v2381_v51  ;;  %1749 = vmatprep.mubr.f32.mxu0 %v267_v52  ;;  %v2394_v59 = vadd.f32 %v2351_v32, %v206_v58  ;;  %v2401_v63 = vmax.f32 %v441_v53, 0.0 }
  0xed   :  { %v2396_v60 = vmax.f32 %v436_v56, 0.0  ;;  %1750 = vmatmul.mubr.f32.gmra.mrb[18].mxu0 %v268_v48  ;;  %v270_v61 = vmax.f32 %v2388_v57, 0.0  ;;  %v1642_v62 = vpop.f32.mrb[4].mxu1 }
  0xee   :  { %v451_v0 = vadd.f32 %v1642_v62, %v2359_v36  ;;  %v269_v1 = vmax.f32 %v2394_v59, 0.0  ;;  %v445_v2 = vpop.f32.mrb[5].mxu1  ;;  %v1609_v3 = vpop.f32.mrb[6].mxu0  ;;  %v1075_v34 = vsub.f32 %v268_v48, %v2401_v63 }
  0xef   :  { %v446_v4 = vadd.f32 %v2359_v36, %v445_v2  ;;  %1693 = vmatprep.mubr.f32.mxu1 %v2396_v60  ;;  %v2408_v5 = vadd.f32 %v1609_v3, %v2351_v32  ;;  %v216_v6 = vpop.f32.mrb[7].mxu0  ;;  %v1074_v44 = vsub.f32 %v267_v52, %v2396_v60 }
  0xf0   :  { %v2410_v7 = vmax.f32 %v451_v0, 0.0  ;;  %1694 = vmatmul.mubr.f32.gmra.mrb[18].mxu1 %v2401_v63  ;;  %1752 = vmatprep.mubr.f32.mxu0 %v269_v1  ;;  %v2416_v8 = vadd.f32 %v2351_v32, %v216_v6 }
  0xf1   :  { %v2418_v9 = vmax.f32 %v446_v4, 0.0  ;;  %v272_v10 = vmax.f32 %v2408_v5, 0.0  ;;  %v1645_v11 = vpop.f32.mrb[6].mxu1  ;;  %1753 = vmatmul.mubr.f32.gmra.mrb[20].mxu0 %v270_v61 }
  0xf2   :  { %v461_v12 = vadd.f32 %v1645_v11, %v2359_v36  ;;  %v2896_v13 = vmax.f32 %v2416_v8, 0.0  ;;  %v455_v14 = vpop.f32.mrb[7].mxu1  ;;  %v1612_v15 = vpop.f32.mrb[8].mxu0 }
  0xf3   :  { %1696 = vmatprep.mubr.f32.mxu1 %v2418_v9  ;;  %v456_v16 = vadd.f32 %v2359_v36, %v455_v14  ;;  %v2428_v17 = vadd.f32 %v1612_v15, %v2351_v32  ;;  %v226_v18 = vpop.f32.mrb[9].mxu0 }
  0xf4   :  { %v2430_v19 = vmax.f32 %v461_v12, 0.0  ;;  %1697 = vmatmul.mubr.f32.gmra.mrb[20].mxu1 %v2410_v7  ;;  %v2434_v20 = vadd.f32 %v2351_v32, %v226_v18  ;;  %1755 = vmatprep.mubr.f32.mxu0 %v2896_v13 }
  0xf5   :  { %v2438_v21 = vmax.f32 %v456_v16, 0.0  ;;  %v274_v22 = vmax.f32 %v2428_v17, 0.0  ;;  %v1648_v23 = vpop.f32.mrb[8].mxu1  ;;  %1756 = vmatmul.mubr.f32.gmra.mrb[22].mxu0 %v272_v10 }
  0xf6   :  { %v471_v24 = vadd.f32 %v1648_v23, %v2359_v36  ;;  %v2895_v25 = vmax.f32 %v2434_v20, 0.0  ;;  %v465_v26 = vpop.f32.mrb[9].mxu1  ;;  %v1615_v27 = vpop.f32.mrb[10].mxu0 }
  0xf7   :  { %v466_v28 = vadd.f32 %v2359_v36, %v465_v26  ;;  %1699 = vmatprep.mubr.f32.mxu1 %v2438_v21  ;;  %v2448_v29 = vadd.f32 %v1615_v27, %v2351_v32  ;;  %v236_v30 = vpop.f32.mrb[11].mxu0 }
  0xf8   :  { %v2450_v31 = vmax.f32 %v471_v24, 0.0  ;;  %1700 = vmatmul.mubr.f32.gmra.mrb[22].mxu1 %v2430_v19  ;;  %v2454_v33 = vadd.f32 %v2351_v32, %v236_v30  ;;  %1758 = vmatprep.mubr.f32.mxu0 %v2895_v25 }
  0xf9   :  { %v2458_v35 = vmax.f32 %v466_v28, 0.0  ;;  %v2894_v39 = vmax.f32 %v2448_v29, 0.0  ;;  %v1651_v41 = vpop.f32.mrb[10].mxu1  ;;  %1759 = vmatmul.mubr.f32.gmra.mrb[24].mxu0 %v274_v22 }
  0xfa   :  { %v481_v42 = vadd.f32 %v1651_v41, %v2359_v36  ;;  %v2892_v43 = vmax.f32 %v2454_v33, 0.0  ;;  %v475_v45 = vpop.f32.mrb[11].mxu1  ;;  %v1618_v46 = vpop.f32.mrb[12].mxu0 }
  0xfb   :  { %v476_v50 = vadd.f32 %v2359_v36, %v475_v45  ;;  %1702 = vmatprep.mubr.f32.mxu1 %v2458_v35  ;;  %v2468_v53 = vadd.f32 %v1618_v46, %v2351_v32  ;;  %v246_v54 = vpop.f32.mrb[13].mxu0  ;;  %v2521_v46 = vld [vmem:[%s2884_s8] ss:$0 sm:$0xff]  ;;  %s2022_s8 = smov [#allocation5]  }
  0xfc   :  { %v2470_v55 = vmax.f32 %v481_v42, 0.0  ;;  %1703 = vmatmul.mubr.f32.gmra.mrb[24].mxu1 %v2450_v31  ;;  %v2474_v56 = vadd.f32 %v2351_v32, %v246_v54  ;;  %1761 = vmatprep.mubr.f32.mxu0 %v2892_v43 }
  0xfd   :  { %v2478_v58 = vmax.f32 %v476_v50, 0.0  ;;  %v2893_v62 = vmax.f32 %v2468_v53, 0.0  ;;  %v1654_v0 = vpop.f32.mrb[12].mxu1  ;;  %1762 = vmatmul.mubr.f32.gmra.mrb[26].mxu0 %v2894_v39 }
  0xfe   :  { %v491_v2 = vadd.f32 %v1654_v0, %v2359_v36  ;;  %v2890_v3 = vmax.f32 %v2474_v56, 0.0  ;;  %v485_v4 = vpop.f32.mrb[13].mxu1  ;;  %v1621_v6 = vpop.f32.mrb[14].mxu0 }
  0xff   :  { %v486_v11 = vadd.f32 %v2359_v36, %v485_v4  ;;  %1705 = vmatprep.mubr.f32.mxu1 %v2478_v58  ;;  %v2488_v12 = vadd.f32 %v1621_v6, %v2351_v32  ;;  %v256_v14 = vpop.f32.mrb[15].mxu0 }
 0x100   :  { %v2490_v15 = vmax.f32 %v491_v2, 0.0  ;;  %1706 = vmatmul.mubr.f32.gmra.mrb[26].mxu1 %v2470_v55  ;;  %v2494_v16 = vadd.f32 %v2351_v32, %v256_v14  ;;  %1764 = vmatprep.mubr.f32.mxu0 %v2890_v3 }
 0x101   :  { %v2498_v18 = vmax.f32 %v486_v11, 0.0  ;;  %v2891_v23 = vmax.f32 %v2488_v12, 0.0  ;;  %v1657_v24 = vpop.f32.mrb[14].mxu1  ;;  %1765 = vmatmul.mubr.f32.gmra.mrb[28].mxu0 %v2893_v62 }
 0x102   :  { %v501_v26 = vadd.f32 %v1657_v24, %v2359_v36  ;;  %v2889_v27 = vmax.f32 %v2494_v16, 0.0  ;;  %v495_v28 = vpop.f32.mrb[15].mxu1  ;;  %v2528_v24 = vld [vmem:[%s2885_s9] ss:$0 sm:$0xff]  ;;  %s1419_s9 = sshll.u32 %s2022_s8, 4  ;;  %s1420_s9 = int_to_ptr.vmem [resolvable:$true] %s1419_s9 }
 0x103   :  { %v496_v30 = vadd.f32 %v2359_v36, %v495_v28  ;;  %1708 = vmatprep.mubr.f32.mxu1 %v2498_v18  ;;  %s1973_s27 = scalar_lea.vmem %s1420_s9, 16  ;;  %s1977_s28 = scalar_lea.vmem %s1420_s9, 32 }
 0x104   :  { %v2507_v32 = vmax.f32 %v501_v26, 0.0  ;;  %1709 = vmatmul.mubr.f32.gmra.mrb[28].mxu1 %v2490_v15  ;;  %1767 = vmatprep.mubr.f32.mxu0 %v2889_v27  ;;  %p1974_p0 = scmp.ne.s32.totalorder %s1420_s9, %s1973_s27  ;;  %p1978_p1 = scmp.lt.s32.totalorder %s1420_s9, %s1420_s9 }
 0x105   :  { %v2512_v41 = vmax.f32 %v496_v30, 0.0  ;;  %1768 = vmatmul.mubr.f32.gmra.mrb[30].mxu0 %v2891_v23  ;;  %p1979_p2 = scmp.lt.s32.totalorder %s1977_s28, %s1973_s27 }
 0x107   :  { %1711 = vmatprep.mubr.f32.mxu1 %v2512_v41  ;;  %p1980_p3 = por %p1979_p2, %p1978_p1 }
 0x108   :  { %1712 = vmatmul.mubr.f32.gmra.mrb[30].mxu1 %v2507_v32 }
 0x109   :  { %p1981_p4 = pnand %p1980_p3, %p1974_p0 }
 0x1bc   :  { %v1748_v42 = vpop.f32.mrb[16].mxu0 }
 0x1bd   :  { %v763_v36 = vpop.f32.mrb[17].mxu0 }
 0x1bf   :  { %v1692_v45 = vpop.f32.mrb[16].mxu1 }
 0x1c0   :  { %v769_v50 = vadd.f32 %v1748_v42, %v1692_v45  ;;  %v618_v54 = vpop.f32.mrb[17].mxu1  ;;  %v1751_v0 = vpop.f32.mrb[18].mxu0 }
 0x1c1   :  { %v764_v2 = vadd.f32 %v763_v36, %v618_v54  ;;  %v773_v4 = vpop.f32.mrb[19].mxu0 }
 0x1c2   :  { %v850_v6 = vadd.f32 %v2521_v46, %v769_v50 }
 0x1c3   :  { %v849_v11 = vadd.f32 %v2521_v46, %v764_v2  ;;  %v1695_v14 = vpop.f32.mrb[18].mxu1 }
 0x1c4   :  { %v866_v26 = vmax.f32 %v850_v6, 0.0  ;;  %v779_v28 = vadd.f32 %v1751_v0, %v1695_v14  ;;  %v628_v30 = vpop.f32.mrb[19].mxu1  ;;  %v1754_v27 = vpop.f32.mrb[20].mxu0 }
 0x1c5   :  { %v865_v3 = vmax.f32 %v849_v11, 0.0  ;;  %v774_v42 = vadd.f32 %v773_v4, %v628_v30  ;;  %v783_v45 = vpop.f32.mrb[21].mxu0 }
 0x1c6   :  { %v852_v36 = vadd.f32 %v2521_v46, %v779_v28  ;;  %v889_v50 = vmul.f32 %v2528_v24, %v866_v26 }
 0x1c7   :  { %v851_v54 = vadd.f32 %v2521_v46, %v774_v42  ;;  %v1698_v2 = vpop.f32.mrb[20].mxu1  ;;  %v888_v23 = vmul.f32 %v2528_v24, %v865_v3 }
 0x1c8   :  { %v868_v43 = vmax.f32 %v852_v36, 0.0  ;;  %v789_v62 = vadd.f32 %v1754_v27, %v1698_v2  ;;  %v638_v39 = vpop.f32.mrb[21].mxu1  ;;  %v908_v0 = vsel %vm904_vm2, %v889_v50, 0.0  ;;  %v1757_v6 = vpop.f32.mrb[22].mxu0 }
 0x1c9   :  { %v867_v14 = vmax.f32 %v851_v54, 0.0  ;;  %909 = vadd.xlane.f32.xlu0 %v908_v0  ;;  %v784_v4 = vadd.f32 %v783_v45, %v638_v39  ;;  %v793_v11 = vpop.f32.mrb[23].mxu0  ;;  %v905_v42 = vsel %vm904_vm2, %v888_v23, 0.0 }
 0x1ca   :  { %v854_v30 = vadd.f32 %v2521_v46, %v789_v62  ;;  %v891_v28 = vmul.f32 %v2528_v24, %v868_v43 }
 0x1cb   :  { %v853_v26 = vadd.f32 %v2521_v46, %v784_v4  ;;  %v1701_v25 = vpop.f32.mrb[22].mxu1  ;;  %v890_v50 = vmul.f32 %v2528_v24, %v867_v14 }
 0x1cc   :  { %v870_v3 = vmax.f32 %v854_v30, 0.0  ;;  %v914_v27 = vsel %vm904_vm2, %v891_v28, 0.0  ;;  %v799_v36 = vadd.f32 %v1757_v6, %v1701_v25  ;;  %v648_v2 = vpop.f32.mrb[23].mxu1  ;;  %v1760_v54 = vpop.f32.mrb[24].mxu0 }
 0x1cd   :  { %v869_v0 = vmax.f32 %v853_v26, 0.0  ;;  %915 = vadd.xlane.f32.xlu1 %v914_v27  ;;  %906 = vadd.xlane.f32.xlu0 %v905_v42  ;;  %v794_v39 = vadd.f32 %v793_v11, %v648_v2  ;;  %v803_v62 = vpop.f32.mrb[25].mxu0  ;;  %v911_v28 = vsel %vm904_vm2, %v890_v50, 0.0 }
 0x1ce   :  { %v856_v43 = vadd.f32 %v2521_v46, %v799_v36  ;;  %v893_v6 = vmul.f32 %v2528_v24, %v870_v3 }
 0x1cf   :  { %v855_v45 = vadd.f32 %v2521_v46, %v794_v39  ;;  %v1704_v4 = vpop.f32.mrb[24].mxu1  ;;  %v892_v23 = vmul.f32 %v2528_v24, %v869_v0 }
 0x1d0   :  { %v872_v30 = vmax.f32 %v856_v43, 0.0  ;;  %v809_v25 = vadd.f32 %v1760_v54, %v1704_v4  ;;  %v658_v14 = vpop.f32.mrb[25].mxu1  ;;  %v1763_v13 = vpop.f32.mrb[26].mxu0  ;;  %v920_v3 = vsel %vm904_vm2, %v893_v6, 0.0 }
 0x1d1   :  { %v871_v26 = vmax.f32 %v855_v45, 0.0  ;;  %912 = vadd.xlane.f32.xlu1 %v911_v28  ;;  %v917_v11 = vsel %vm904_vm2, %v892_v23, 0.0  ;;  %v804_v42 = vadd.f32 %v803_v62, %v658_v14  ;;  %v813_v27 = vpop.f32.mrb[27].mxu0 }
 0x1d2   :  { %v858_v36 = vadd.f32 %v2521_v46, %v809_v25  ;;  %918 = vadd.xlane.f32.xlu0 %v917_v11  ;;  %v895_v2 = vmul.f32 %v2528_v24, %v872_v30 }
 0x1d3   :  { %v857_v0 = vadd.f32 %v2521_v46, %v804_v42  ;;  %v1707_v39 = vpop.f32.mrb[26].mxu1  ;;  %v894_v50 = vmul.f32 %v2528_v24, %v871_v26 }
 0x1d4   :  { %v874_v54 = vmax.f32 %v858_v36, 0.0  ;;  %v819_v43 = vadd.f32 %v1763_v13, %v1707_v39  ;;  %v668_v45 = vpop.f32.mrb[27].mxu1  ;;  %v1766_v4 = vpop.f32.mrb[28].mxu0  ;;  %v926_v30 = vsel %vm904_vm2, %v895_v2, 0.0 }
 0x1d5   :  { %921 = vadd.xlane.f32.xlu1 %v920_v3  ;;  %v873_v23 = vmax.f32 %v857_v0, 0.0  ;;  %v814_v62 = vadd.f32 %v813_v27, %v668_v45  ;;  %v923_v28 = vsel %vm904_vm2, %v894_v50, 0.0  ;;  %v823_v25 = vpop.f32.mrb[29].mxu0 }
 0x1d6   :  { %v860_v14 = vadd.f32 %v2521_v46, %v819_v43  ;;  %924 = vadd.xlane.f32.xlu0 %v923_v28  ;;  %v897_v11 = vmul.f32 %v2528_v24, %v874_v54 }
 0x1d7   :  { %v859_v26 = vadd.f32 %v2521_v46, %v814_v62  ;;  %v1710_v42 = vpop.f32.mrb[28].mxu1  ;;  %v896_v13 = vmul.f32 %v2528_v24, %v873_v23 }
 0x1d8   :  { %v876_v6 = vmax.f32 %v860_v14, 0.0  ;;  %v829_v36 = vadd.f32 %v1766_v4, %v1710_v42  ;;  %v678_v39 = vpop.f32.mrb[29].mxu1  ;;  %v1769_v0 = vpop.f32.mrb[30].mxu0  ;;  %v932_v45 = vsel %vm904_vm2, %v897_v11, 0.0 }
 0x1d9   :  { %927 = vadd.xlane.f32.xlu1 %v926_v30  ;;  %v875_v27 = vmax.f32 %v859_v26, 0.0  ;;  %v824_v50 = vadd.f32 %v823_v25, %v678_v39  ;;  %v929_v3 = vsel %vm904_vm2, %v896_v13, 0.0  ;;  %v833_v43 = vpop.f32.mrb[31].mxu0 }
 0x1da   :  { %v862_v2 = vadd.f32 %v2521_v46, %v829_v36  ;;  %v899_v54 = vmul.f32 %v2528_v24, %v876_v6  ;;  %930 = vadd.xlane.f32.xlu0 %v929_v3 }
 0x1db   :  { %v861_v62 = vadd.f32 %v2521_v46, %v824_v50  ;;  %v1713_v23 = vpop.f32.mrb[30].mxu1  ;;  %v898_v4 = vmul.f32 %v2528_v24, %v875_v27 }
 0x1dc   :  { %v878_v28 = vmax.f32 %v862_v2, 0.0  ;;  %v839_v14 = vadd.f32 %v1769_v0, %v1713_v23  ;;  %v688_v30 = vpop.f32.mrb[31].mxu1  ;;  %v938_v11 = vsel %vm904_vm2, %v899_v54, 0.0 }
 0x1dd   :  { %933 = vadd.xlane.f32.xlu1 %v932_v45  ;;  %v877_v25 = vmax.f32 %v861_v62, 0.0  ;;  %v834_v26 = vadd.f32 %v833_v43, %v688_v30  ;;  %v935_v42 = vsel %vm904_vm2, %v898_v4, 0.0  ;;  %v2576_v62 = vld [vmem:[#allocation2] ss:$0 sm:$0xff] }
 0x1de   :  { %v864_v13 = vadd.f32 %v2521_v46, %v839_v14  ;;  %v901_v6 = vmul.f32 %v2528_v24, %v878_v28  ;;  %936 = vadd.xlane.f32.xlu0 %v935_v42 }
 0x1df   :  { %v863_v36 = vadd.f32 %v2521_v46, %v834_v26  ;;  %v900_v39 = vmul.f32 %v2528_v24, %v877_v25  ;;  %v2021_v46 = vmov 0  }
 0x1e0   :  { %v880_v27 = vmax.f32 %v864_v13, 0.0  ;;  %v944_v3 = vsel %vm904_vm2, %v901_v6, 0.0  ;;  %1875 = vset.pattern.permute.xlu1 %v2021_v46  ;;  %1876 = vset.pattern.permute.xlu0 %v2021_v46 }
 0x1e1   :  { %939 = vadd.xlane.f32.xlu1 %v938_v11  ;;  %v879_v0 = vmax.f32 %v863_v36, 0.0  ;;  %v941_v50 = vsel %vm904_vm2, %v900_v39, 0.0 }
 0x1e2   :  { %v903_v43 = vmul.f32 %v2528_v24, %v880_v27  ;;  %942 = vadd.xlane.f32.xlu0 %v941_v50 }
 0x1e3   :  { %v902_v2 = vmul.f32 %v2528_v24, %v879_v0 }
 0x1e4   :  { %v950_v54 = vsel %vm904_vm2, %v903_v43, 0.0 }
 0x1e5   :  { %945 = vadd.xlane.f32.xlu1 %v944_v3  ;;  %v947_v45 = vsel %vm904_vm2, %v902_v2, 0.0 }
 0x1e6   :  { %948 = vadd.xlane.f32.xlu0 %v947_v45 }
 0x1e9   :  { %951 = vadd.xlane.f32.xlu1 %v950_v54 }
 0x256   :  { %v910_v23 = vpop.xlane.xlu0 %909 }
 0x257   :  { %v961_v4 = vadd.f32 %v2576_v62, %v910_v23 }
 0x259   :  { %v1469_v28 = vmul.f32 -1.442695, %v961_v4 }
 0x25a   :  { %v916_v14 = vpop.xlane.xlu1 %915  ;;  %v907_v30 = vpop.xlane.xlu0 %906 }
 0x25b   :  { %1877 = vpow2.f32 %v1469_v28  ;;  %v963_v24 = vadd.f32 %v2576_v62, %v916_v14  ;;  %v960_v25 = vadd.f32 %v2576_v62, %v907_v30 }
 0x25d   :  { %v1471_v26 = vmul.f32 -1.442695, %v963_v24  ;;  %v1468_v42 = vmul.f32 -1.442695, %v960_v25 }
 0x25e   :  { %v913_v13 = vpop.xlane.xlu1 %912 }
 0x25f   :  { %1879 = vpow2.f32 %v1471_v26  ;;  %v962_v11 = vadd.f32 %v2576_v62, %v913_v13  ;;  %v919_v6 = vpop.xlane.xlu0 %918 }
 0x260   :  { %1881 = vpow2.f32 %v1468_v42  ;;  %v964_v36 = vadd.f32 %v2576_v62, %v919_v6 }
 0x261   :  { %v1470_v39 = vmul.f32 -1.442695, %v962_v11 }
 0x262   :  { %v1472_v27 = vmul.f32 -1.442695, %v964_v36  ;;  %v922_v0 = vpop.xlane.xlu1 %921 }
 0x263   :  { %1883 = vpow2.f32 %v1470_v39  ;;  %v965_v50 = vadd.f32 %v2576_v62, %v922_v0  ;;  %v925_v3 = vpop.xlane.xlu0 %924 }
 0x264   :  { %v966_v43 = vadd.f32 %v2576_v62, %v925_v3  ;;  %1885 = vpow2.f32 %v1472_v27 }
 0x265   :  { %v1878_v2 = vpop.eup %1877  ;;  %v1473_v45 = vmul.f32 -1.442695, %v965_v50 }
 0x266   :  { %v1025_v54 = vadd.f32 1.0, %v1878_v2  ;;  %v928_v46 = vpop.xlane.xlu1 %927  ;;  %v1474_v23 = vmul.f32 -1.442695, %v966_v43 }
 0x267   :  { %1887 = vpow2.f32 %v1473_v45  ;;  %v967_v4 = vadd.f32 %v2576_v62, %v928_v46  ;;  %v931_v28 = vpop.xlane.xlu0 %930 }
 0x268   :  { %1889 = vrcp.f32 %v1025_v54  ;;  %v968_v42 = vadd.f32 %v2576_v62, %v931_v28 }
 0x269   :  { %v1880_v14 = vpop.eup %1879  ;;  %v1475_v30 = vmul.f32 -1.442695, %v967_v4  ;;  %1891 = vpow2.f32 %v1474_v23 }
 0x26a   :  { %v1882_v24 = vpop.eup %1881  ;;  %v1027_v25 = vadd.f32 1.0, %v1880_v14  ;;  %v934_v26 = vpop.xlane.xlu1 %933  ;;  %v1476_v50 = vmul.f32 -1.442695, %v968_v42 }
 0x26b   :  { %v1024_v13 = vadd.f32 1.0, %v1882_v24  ;;  %1893 = vpow2.f32 %v1475_v30  ;;  %v969_v11 = vadd.f32 %v2576_v62, %v934_v26  ;;  %v937_v6 = vpop.xlane.xlu0 %936 }
 0x26c   :  { %1895 = vrcp.f32 %v1027_v25  ;;  %v970_v3 = vadd.f32 %v2576_v62, %v937_v6 }
 0x26d   :  { %v1884_v36 = vpop.eup %1883  ;;  %1897 = vrcp.f32 %v1024_v13  ;;  %v1477_v39 = vmul.f32 -1.442695, %v969_v11 }
 0x26e   :  { %v1026_v27 = vadd.f32 1.0, %v1884_v36  ;;  %v940_v0 = vpop.xlane.xlu1 %939  ;;  %v1886_v45 = vpop.eup %1885  ;;  %v1478_v14 = vmul.f32 -1.442695, %v970_v3 }
 0x26f   :  { %1899 = vpow2.f32 %v1477_v39  ;;  %v971_v43 = vadd.f32 %v2576_v62, %v940_v0  ;;  %v943_v2 = vpop.xlane.xlu0 %942  ;;  %v1028_v26 = vadd.f32 1.0, %v1886_v45 }
 0x270   :  { %1901 = vrcp.f32 %v1026_v27  ;;  %v972_v30 = vadd.f32 %v2576_v62, %v943_v2 }
 0x271   :  { %v1888_v54 = vpop.eup %1887  ;;  %v1479_v46 = vmul.f32 -1.442695, %v971_v43  ;;  %1903 = vpow2.f32 %v1476_v50 }
 0x272   :  { %v1890_v23 = vpop.eup %1889  ;;  %v1029_v4 = vadd.f32 1.0, %v1888_v54  ;;  %v946_v28 = vpop.xlane.xlu1 %945  ;;  %v1480_v39 = vmul.f32 -1.442695, %v972_v30 }
 0x273   :  { %1905 = vpow2.f32 %v1479_v46  ;;  %v973_v24 = vadd.f32 %v2576_v62, %v946_v28  ;;  %1095 = vperm.xlu1 %1875, %v1890_v23   ;;  %v1892_v25 = vpop.eup %1891  ;;  %v949_v42 = vpop.xlane.xlu0 %948 }
 0x274   :  { %1907 = vrcp.f32 %v1029_v4  ;;  %v974_v3 = vadd.f32 %v2576_v62, %v949_v42  ;;  %v1030_v54 = vadd.f32 1.0, %v1892_v25 }
 0x275   :  { %v1894_v13 = vpop.eup %1893  ;;  %v1481_v11 = vmul.f32 -1.442695, %v973_v24  ;;  %1909 = vpow2.f32 %v1478_v14 }
 0x276   :  { %v1896_v6 = vpop.eup %1895  ;;  %v952_v36 = vpop.xlane.xlu1 %951  ;;  %v1031_v0 = vadd.f32 1.0, %v1894_v13  ;;  %v1482_v23 = vmul.f32 -1.442695, %v974_v3 }
 0x277   :  { %v1898_v27 = vpop.eup %1897  ;;  %1911 = vpow2.f32 %v1481_v11  ;;  %v975_v50 = vadd.f32 %v2576_v62, %v952_v36  ;;  %1105 = vperm.xlu1 %1875, %v1896_v6  }
 0x278   :  { %1913 = vrcp.f32 %v1028_v26  ;;  %1090 = vperm.xlu0 %1876, %v1898_v27  }
 0x279   :  { %v1900_v43 = vpop.eup %1899  ;;  %v1483_v2 = vmul.f32 -1.442695, %v975_v50  ;;  %1915 = vpow2.f32 %v1480_v39 }
 0x27a   :  { %v1902_v45 = vpop.eup %1901  ;;  %v1033_v46 = vadd.f32 1.0, %v1900_v43  ;;  %1917 = vrcp.f32 %v1031_v0 }
 0x27b   :  { %1100 = vperm.xlu1 %1875, %v1902_v45   ;;  %v1904_v4 = vpop.eup %1903 }
 0x27c   :  { %1919 = vrcp.f32 %v1033_v46  ;;  %v1032_v24 = vadd.f32 1.0, %v1904_v4 }
 0x27d   :  { %v1906_v28 = vpop.eup %1905  ;;  %1921 = vpow2.f32 %v1483_v2 }
 0x27e   :  { %v1908_v14 = vpop.eup %1907  ;;  %1923 = vrcp.f32 %v1030_v54  ;;  %v1035_v30 = vadd.f32 1.0, %v1906_v28 }
 0x27f   :  { %1925 = vpow2.f32 %v1482_v23  ;;  %1115 = vperm.xlu1 %1875, %v1908_v14   ;;  %v1910_v62 = vpop.eup %1909  ;;  %v1312_v14 = vlaneseq }
 0x280   :  { %1927 = vrcp.f32 %v1035_v30  ;;  %v1034_v11 = vadd.f32 1.0, %v1910_v62 }
 0x281   :  { %v1912_v26 = vpop.eup %1911  ;;  %1929 = vrcp.f32 %v1032_v24  ;;  %v2594_v30 = vshrl.u32 %v1312_v14, 7  ;;  %v1073_v24 = vsub.f32 %v266_v38, %v2381_v51 }
 0x282   :  { %v1914_v42 = vpop.eup %1913  ;;  %v1037_v25 = vadd.f32 1.0, %v1912_v26 }
 0x283   :  { %1110 = vperm.xlu1 %1875, %v1914_v42   ;;  %v1916_v13 = vpop.eup %1915  ;;  %v1314_v62 = vadd.s32 8, %v2594_v30  ;;  %v1315_v42 = vadd.s32 16, %v2594_v30 }
 0x284   :  { %1931 = vrcp.f32 %v1037_v25  ;;  %v1918_v6 = vpop.eup %1917  ;;  %v1036_v50 = vadd.f32 1.0, %v1916_v13  ;;  %v1331_v13 = vand.u32 127, %v2594_v30 }
 0x285   :  { %1933 = vrcp.f32 %v1034_v11  ;;  %v1072_v11 = vsub.f32 %v265_v40, %v2377_v49 }
 0x286   :  { %v1920_v36 = vpop.eup %1919 }
 0x287   :  { %v1922_v39 = vpop.eup %1921  ;;  %1135 = vperm.xlu0 %1876, %v1920_v36   ;;  %1125 = vperm.xlu1 %1875, %v1918_v6   ;;  %v2608_v36 = vand.u32 127, %v1312_v14 }
 0x288   :  { %v1924_v27 = vpop.eup %1923  ;;  %v1039_v0 = vadd.f32 1.0, %v1922_v39  ;;  %v1332_v39 = vand.u32 127, %v1314_v62 }
 0x289   :  { %v1926_v3 = vpop.eup %1925  ;;  %vm2617_vm3 = vcmp.eq.s32.totalorder %v1331_v13, %v2608_v36 }
 0x28a   :  { %v1928_v43 = vpop.eup %1927  ;;  %1935 = vrcp.f32 %v1039_v0  ;;  %v1038_v2 = vadd.f32 1.0, %v1926_v3  ;;  %v1316_v0 = vadd.s32 24, %v2594_v30  ;;  %vm1348_vm4 = vcmp.eq.s32.totalorder %v1332_v39, %v2608_v36 }
 0x28b   :  { %1145 = vperm.xlu0 %1876, %v1928_v43   ;;  %1120 = vperm.xlu1 %1875, %v1924_v27   ;;  %1937 = vrcp.f32 %v1036_v50  ;;  %v1930_v45 = vpop.eup %1929  ;;  %v1333_v27 = vand.u32 127, %v1315_v42  ;;  %v1317_v43 = vadd.s32 32, %v2594_v30  ;;  %v1318_v42 = vadd.s32 40, %v2594_v30 }
 0x28c   :  { %1939 = vrcp.f32 %v1038_v2  ;;  %v1076_v39 = vsub.f32 %v269_v1, %v2418_v9 }
 0x28d   :  { %vm2627_vm5 = vcmp.eq.s32.totalorder %v1333_v27, %v2608_v36  ;;  %v1336_v27 = vand.u32 127, %v1318_v42 }
 0x28e   :  { %v1932_v54 = vpop.eup %1931 }
 0x28f   :  { %1155 = vperm.xlu0 %1876, %v1932_v54   ;;  %1130 = vperm.xlu1 %1875, %v1930_v45   ;;  %v1934_v46 = vpop.eup %1933  ;;  %v1334_v54 = vand.u32 127, %v1316_v0  ;;  %vm2690_vm8 = vcmp.eq.s32.totalorder %v1336_v27, %v2608_v36 }
 0x291   :  { %vm2651_vm6 = vcmp.eq.s32.totalorder %v1334_v54, %v2608_v36 }
 0x293   :  { %1140 = vperm.xlu1 %1875, %v1934_v46  }
 0x294   :  { %v1936_v23 = vpop.eup %1935 }
 0x295   :  { %1165 = vperm.xlu0 %1876, %v1936_v23   ;;  %v1938_v4 = vpop.eup %1937 }
 0x296   :  { %v1940_v28 = vpop.eup %1939 }
 0x297   :  { %1150 = vperm.xlu1 %1875, %v1938_v4   ;;  %v1335_v4 = vand.u32 127, %v1317_v43  ;;  %v1079_v43 = vsub.f32 %v272_v10, %v2430_v19  ;;  %v1323_v10 = vadd.s32 80, %v2594_v30 }
 0x299   :  { %vm2660_vm7 = vcmp.eq.s32.totalorder %v1335_v4, %v2608_v36 }
 0x29b   :  { %1160 = vperm.xlu1 %1875, %v1940_v28  }
 0x2f2   :  { %v1096_v26 = vpop.permute.xlu1 %1095 }
 0x2f3   :  { %v1169_v25 = vmul.f32 %v1096_v26, %v1073_v24  ;;  %v1364_v28 = vsel %vm1348_vm4, %v1096_v26, 0.0 }
 0x2f5   :  { %v2606_v6 = vadd.f32 %v1169_v25, %v2381_v51 }
 0x2f6   :  { %v1106_v38 = vpop.permute.xlu1 %1105 }
 0x2f7   :  { %v1091_v50 = vpop.permute.xlu0 %1090  ;;  %v1201_v3 = vmul.f32 %v2606_v6, %v2606_v6  ;;  %v1171_v37 = vmul.f32 %v1106_v38, %v1075_v34 }
 0x2f8   :  { %v1168_v51 = vmul.f32 %v1091_v50, %v1072_v11  ;;  %v1363_v46 = vsel %vm2617_vm3, %v1091_v50, 0.0  ;;  %v1320_v50 = vadd.s32 56, %v2594_v30 }
 0x2f9   :  { %1218 = vadd.xlane.f32.xlu0 %v1201_v3  ;;  %v2639_v52 = vadd.f32 %v1171_v37, %v2401_v63  ;;  %v1379_v62 = vadd.f32 %v1364_v28, %v1363_v46  ;;  %v1366_v3 = vsel %vm2651_vm6, %v1106_v38, 0.0  ;;  %v1322_v38 = vadd.s32 72, %v2594_v30 }
 0x2fa   :  { %v1101_v2 = vpop.permute.xlu1 %1100  ;;  %v2632_v45 = vadd.f32 %v1168_v51, %v2377_v49  ;;  %v1077_v49 = vsub.f32 %v270_v61, %v2410_v7  ;;  %v1319_v61 = vadd.s32 48, %v2594_v30  ;;  %v1338_v46 = vand.u32 127, %v1320_v50 }
 0x2fb   :  { %v1170_v23 = vmul.f32 %v1101_v2, %v1074_v44  ;;  %v1365_v14 = vsel %vm2627_vm5, %v1101_v2, 0.0  ;;  %v1203_v57 = vmul.f32 %v2639_v52, %v2639_v52  ;;  %v1081_v44 = vsub.f32 %v274_v22, %v2450_v31 }
 0x2fc   :  { %v1200_v47 = vmul.f32 %v2632_v45, %v2632_v45  ;;  %v1380_v11 = vadd.f32 %v1379_v62, %v1365_v14  ;;  %v1337_v1 = vand.u32 127, %v1319_v61  ;;  %v2907_v22 = vmax.f32 %v2416_v8, 0.0 }
 0x2fd   :  { %v2647_v24 = vadd.f32 %v1170_v23, %v2396_v60  ;;  %v2911_v62 = vmax.f32 %v2448_v29, 0.0  ;;  %vm2718_vm10 = vcmp.eq.s32.totalorder %v1338_v46, %v2608_v36  ;;  %v1341_v61 = vand.u32 127, %v1323_v10 }
 0x2fe   :  { %1216 = vadd.xlane.f32.xlu1 %v1200_v47  ;;  %v1116_v25 = vpop.permute.xlu1 %1115  ;;  %v1381_v59 = vadd.f32 %v1380_v11, %v1366_v3  ;;  %v1078_v4 = vsub.f32 %v2907_v22, %v2438_v21  ;;  %vm2704_vm9 = vcmp.eq.s32.totalorder %v1337_v1, %v2608_v36  ;;  %v1327_v10 = vadd.s32 112, %v2594_v30 }
 0x2ff   :  { %v1173_v26 = vmul.f32 %v1116_v25, %v1077_v49  ;;  %v1202_v13 = vmul.f32 %v2647_v24, %v2647_v24  ;;  %v1083_v42 = vsub.f32 %v2911_v62, %v2470_v55  ;;  %v1368_v8 = vsel %vm2690_vm8, %v1116_v25, 0.0 }
 0x300   :  { %vm2750_vm13 = vcmp.eq.s32.totalorder %v1341_v61, %v2608_v36  ;;  %v2922_v49 = vmax.f32 %v2488_v12, 0.0 }
 0x301   :  { %1220 = vadd.xlane.f32.xlu0 %v1202_v13  ;;  %v2669_v34 = vadd.f32 %v1173_v26, %v2410_v7  ;;  %v1321_v7 = vadd.s32 64, %v2594_v30  ;;  %v1340_v26 = vand.u32 127, %v1322_v38 }
 0x302   :  { %1222 = vadd.xlane.f32.xlu1 %v1203_v57  ;;  %v1111_v0 = vpop.permute.xlu1 %1110  ;;  %v1087_v62 = vsub.f32 %v2922_v49, %v2507_v32 }
 0x303   :  { %v1172_v37 = vmul.f32 %v1111_v0, %v1076_v39  ;;  %v1367_v40 = vsel %vm2660_vm7, %v1111_v0, 0.0  ;;  %v1205_v51 = vmul.f32 %v2669_v34, %v2669_v34  ;;  %v1339_v63 = vand.u32 127, %v1321_v7 }
 0x304   :  { %v1382_v54 = vadd.f32 %v1381_v59, %v1367_v40  ;;  %v1325_v39 = vadd.s32 96, %v2594_v30  ;;  %vm2741_vm12 = vcmp.eq.s32.totalorder %v1340_v26, %v2608_v36 }
 0x305   :  { %v2687_v48 = vadd.f32 %v1172_v37, %v2418_v9  ;;  %v2908_v9 = vmax.f32 %v2434_v20, 0.0  ;;  %v1324_v20 = vadd.s32 88, %v2594_v30  ;;  %vm2734_vm11 = vcmp.eq.s32.totalorder %v1339_v63, %v2608_v36 }
 0x306   :  { %1226 = vadd.xlane.f32.xlu1 %v1205_v51  ;;  %v1126_v23 = vpop.permute.xlu1 %1125  ;;  %v1136_v5 = vpop.permute.xlu0 %1135  ;;  %v1383_v60 = vadd.f32 %v1382_v54, %v1368_v8  ;;  %v1343_v54 = vand.u32 127, %v1325_v39 }
 0x307   :  { %v1175_v47 = vmul.f32 %v1126_v23, %v1079_v43  ;;  %v1177_v17 = vmul.f32 %v1136_v5, %v1081_v44  ;;  %v1080_v28 = vsub.f32 %v2908_v9, %v2458_v35  ;;  %v1204_v14 = vmul.f32 %v2687_v48, %v2687_v48 }
 0x308   :  { %v1370_v59 = vsel %vm2718_vm10, %v1126_v23, 0.0  ;;  %v1326_v44 = vadd.s32 104, %v2594_v30  ;;  %v1372_v9 = vsel %vm2741_vm12, %v1136_v5, 0.0  ;;  %vm2786_vm15 = vcmp.eq.s32.totalorder %v1343_v54, %v2608_v36 }
 0x309   :  { %v2715_v13 = vadd.f32 %v1175_v47, %v2430_v19  ;;  %1224 = vadd.xlane.f32.xlu0 %v1204_v14  ;;  %v2914_v19 = vmax.f32 %v2468_v53, 0.0  ;;  %v2729_v50 = vadd.f32 %v1177_v17, %v2450_v31  ;;  %v1342_v31 = vand.u32 127, %v1324_v20 }
 0x30a   :  { %v1121_v57 = vpop.permute.xlu1 %1120  ;;  %v1146_v29 = vpop.permute.xlu0 %1145 }
 0x30b   :  { %v1174_v27 = vmul.f32 %v1121_v57, %v1078_v4  ;;  %v1369_v25 = vsel %vm2704_vm9, %v1121_v57, 0.0  ;;  %v1085_v0 = vsub.f32 %v2914_v19, %v2490_v15  ;;  %v1179_v37 = vmul.f32 %v1146_v29, %v1083_v42 }
 0x30c   :  { %v1384_v3 = vadd.f32 %v1383_v60, %v1369_v25  ;;  %v1207_v40 = vmul.f32 %v2715_v13, %v2715_v13  ;;  %vm2776_vm14 = vcmp.eq.s32.totalorder %v1342_v31, %v2608_v36  ;;  %v2927_v25 = vmax.f32 %v2474_v56, 0.0 }
 0x30d   :  { %v2746_v1 = vadd.f32 %v1174_v27, %v2438_v21  ;;  %v1209_v21 = vmul.f32 %v2729_v50, %v2729_v50  ;;  %v2762_v4 = vadd.f32 %v1179_v37, %v2470_v55  ;;  %v1344_v55 = vand.u32 127, %v1326_v44 }
 0x30e   :  { %1230 = vadd.xlane.f32.xlu1 %v1207_v40  ;;  %v1131_v7 = vpop.permute.xlu1 %1130  ;;  %v1385_v43 = vadd.f32 %v1384_v3, %v1370_v59  ;;  %v1156_v38 = vpop.permute.xlu0 %1155  ;;  %v1374_v39 = vsel %vm2776_vm14, %v1146_v29, 0.0  ;;  %v1084_v19 = vsub.f32 %v2927_v25, %v2498_v18 }
 0x30f   :  { %v1176_v46 = vmul.f32 %v1131_v7, %v1080_v28  ;;  %v1371_v23 = vsel %vm2734_vm11, %v1131_v7, 0.0  ;;  %v1181_v17 = vmul.f32 %v1156_v38, %v1085_v0  ;;  %v1206_v22 = vmul.f32 %v2746_v1, %v2746_v1 }
 0x310   :  { %v1386_v47 = vadd.f32 %v1385_v43, %v1371_v23  ;;  %v2921_v28 = vmax.f32 %v2454_v33, 0.0  ;;  %v1328_v33 = vadd.s32 120, %v2594_v30  ;;  %v1211_v60 = vmul.f32 %v2762_v4, %v2762_v4 }
 0x311   :  { %v2773_v42 = vadd.f32 %v1176_v46, %v2458_v35  ;;  %1228 = vadd.xlane.f32.xlu0 %v1206_v22  ;;  %v2793_v61 = vadd.f32 %v1181_v17, %v2490_v15  ;;  %v1345_v30 = vand.u32 127, %v1327_v10  ;;  %vm2804_vm0 = vcmp.eq.s32.totalorder %v1344_v55, %v2608_v36 }
 0x312   :  { %v1082_v14 = vsub.f32 %v2921_v28, %v2478_v58  ;;  %1234 = vadd.xlane.f32.xlu1 %v1209_v21  ;;  %v1141_v5 = vpop.permute.xlu1 %1140  ;;  %v1387_v8 = vadd.f32 %v1386_v47, %v1372_v9  ;;  %v1346_v37 = vand.u32 127, %v1328_v33  ;;  %v1376_v31 = vsel %vm2804_vm0, %v1156_v38, 0.0 }
 0x313   :  { %v1373_v12 = vsel %vm2750_vm13, %v1141_v5, 0.0  ;;  %v1208_v35 = vmul.f32 %v2773_v42, %v2773_v42  ;;  %vm1361_vm1 = vcmp.eq.s32.totalorder %v1345_v30, %v2608_v36  ;;  %v2930_v7 = vmax.f32 %v2494_v16, 0.0 }
 0x314   :  { %v1178_v26 = vmul.f32 %v1141_v5, %v1082_v14  ;;  %v1388_v11 = vadd.f32 %v1387_v8, %v1373_v12  ;;  %v1166_v57 = vpop.permute.xlu0 %1165  ;;  %vm1362_vm2 = vcmp.eq.s32.totalorder %v1346_v37, %v2608_v36 }
 0x315   :  { %v1183_v27 = vmul.f32 %v1166_v57, %v1087_v62  ;;  %1232 = vadd.xlane.f32.xlu0 %v1208_v35  ;;  %v1086_v43 = vsub.f32 %v2930_v7, %v2512_v41  ;;  %v1378_v16 = vsel %vm1362_vm2, %v1166_v57, 0.0 }
 0x316   :  { %v2801_v0 = vadd.f32 %v1178_v26, %v2478_v58  ;;  %1238 = vadd.xlane.f32.xlu1 %v1211_v60  ;;  %v1151_v15 = vpop.permute.xlu1 %1150  ;;  %v1389_v40 = vadd.f32 %v1388_v11, %v1374_v39  ;;  %v1213_v58 = vmul.f32 %v2793_v61, %v2793_v61 }
 0x317   :  { %v1180_v51 = vmul.f32 %v1151_v15, %v1084_v19  ;;  %v1375_v29 = vsel %vm2786_vm15, %v1151_v15, 0.0  ;;  %v2816_v53 = vadd.f32 %v1183_v27, %v2507_v32 }
 0x318   :  { %v1210_v56 = vmul.f32 %v2801_v0, %v2801_v0  ;;  %v1390_v59 = vadd.f32 %v1389_v40, %v1375_v29 }
 0x319   :  { %v2824_v44 = vadd.f32 %v1180_v51, %v2498_v18  ;;  %v1215_v38 = vmul.f32 %v2816_v53, %v2816_v53 }
 0x31a   :  { %1236 = vadd.xlane.f32.xlu0 %v1210_v56  ;;  %1242 = vadd.xlane.f32.xlu1 %v1213_v58  ;;  %v1161_v2 = vpop.permute.xlu1 %1160  ;;  %v1391_v54 = vadd.f32 %v1390_v59, %v1376_v31 }
 0x31b   :  { %v1182_v46 = vmul.f32 %v1161_v2, %v1086_v43  ;;  %v1377_v23 = vsel %vm1361_vm1, %v1161_v2, 0.0  ;;  %v1212_v32 = vmul.f32 %v2824_v44, %v2824_v44 }
 0x31c   :  { %v1392_v21 = vadd.f32 %v1391_v54, %v1377_v23 }
 0x31d   :  { %v2832_v10 = vadd.f32 %v1182_v46, %v2512_v41 }
 0x31e   :  { %v1393_v18 = vadd.f32 %v1392_v21, %v1378_v16  ;;  %1240 = vadd.xlane.f32.xlu0 %v1212_v32  ;;  %1246 = vadd.xlane.f32.xlu1 %v1215_v38 }
 0x31f   :  { %v1214_v36 = vmul.f32 %v2832_v10, %v2832_v10 }
 0x320   :  { %v1394_v47 = vrot.slane %v1393_v18, 4 }
 0x322   :  { %1244 = vadd.xlane.f32.xlu0 %v1214_v36  ;;  %v1395_v17 = vadd.f32 %v1394_v47, %v1393_v18 }
 0x324   :  { %v1396_v22 = vrot.slane %v1395_v17, 2 }
 0x326   :  { %v1397_v9 = vadd.f32 %v1396_v22, %v1395_v17 }
 0x328   :  { %v1398_v28 = vrot.slane %v1397_v9, 1 }
 0x32a   :  { %v1399_v14 = vadd.f32 %v1398_v28, %v1397_v9 }
 0x32c   :  { %1400 = vst [vmem:[#allocation5] sm:$0x1] %v1399_v14 }
 0x32d   :  { %1984 = shalt.err (!%p1981_p4)
}
 0x32e   :  { %s1985_s30 = scalar_lea.hbm %s2888_s12, 16 }
 0x32f   :  { %p1986_p5 = scmp.ne.s32.totalorder %s2888_s12, %s1985_s30  ;;  %p1989_p6 = scmp.lt.u32.totalorder %s1985_s30, %s2888_s12 }
 0x331   :  { %p1991_p7 = pnand %p1989_p6, %p1986_p5 }
 0x333   :  { %1994 = shalt.err (!%p1991_p7)
}
 0x334   :  { %1422 = dma.vmem_to_hbm [thread:$0]  %s1420_s9, 16, %s2888_s12, [#allocation6]  }
 0x335   :  { %s2023_s12 = smov [#allocation3]  }
 0x336   :  { %s1406_s17 = sshll.u32 %s2023_s12, 4  ;;  %s1407_s17 = int_to_ptr.vmem [resolvable:$true] %s1406_s17 }
 0x337   :  { %s1995_s18 = scalar_lea.vmem %s1407_s17, 2048  ;;  %p2000_p9 = scmp.lt.s32.totalorder %s1407_s17, %s1407_s17 }
 0x338   :  { %p1996_p8 = scmp.ne.s32.totalorder %s1407_s17, %s1995_s18  ;;  %p2001_p10 = scmp.lt.s32.totalorder %s1995_s18, %s1995_s18 }
 0x33a   :  { %p2002_p11 = por %p2001_p10, %p2000_p9 }
 0x33c   :  { %p2003_p12 = pnand %p2002_p11, %p1996_p8 }
 0x386   :  { %v1219_v41 = vpop.xlane.xlu0 %1218 }
 0x387   :  { %v1249_v49 = vmax.f32 %v1219_v41, 1e-24 }
 0x389   :  { %1941 = vrsqrt.f32 %v1249_v49 }
 0x38b   :  { %v1217_v62 = vpop.xlane.xlu1 %1216 }
 0x38c   :  { %v1248_v63 = vmax.f32 %v1217_v62, 1e-24 }
 0x38e   :  { %1943 = vrsqrt.f32 %v1248_v63  ;;  %v1221_v55 = vpop.xlane.xlu0 %1220 }
 0x38f   :  { %v1223_v5 = vpop.xlane.xlu1 %1222  ;;  %v1250_v8 = vmax.f32 %v1221_v55, 1e-24 }
 0x390   :  { %v1251_v33 = vmax.f32 %v1223_v5, 1e-24 }
 0x391   :  { %1945 = vrsqrt.f32 %v1250_v8 }
 0x392   :  { %1947 = vrsqrt.f32 %v1251_v33 }
 0x393   :  { %v1942_v26 = vpop.eup %1941  ;;  %v1227_v12 = vpop.xlane.xlu1 %1226 }
 0x394   :  { %v1281_v35 = vmul.f32 %v1942_v26, %v2606_v6  ;;  %v1253_v20 = vmax.f32 %v1227_v12, 1e-24 }
 0x396   :  { %1297 = vst [vmem:[#allocation3 + $0x8] sm:$0xff] %v1281_v35  ;;  %1949 = vrsqrt.f32 %v1253_v20  ;;  %v1225_v11 = vpop.xlane.xlu0 %1224 }
 0x397   :  { %v1252_v60 = vmax.f32 %v1225_v11, 1e-24 }
 0x398   :  { %v1944_v57 = vpop.eup %1943 }
 0x399   :  { %v1280_v30 = vmul.f32 %v1944_v57, %v2632_v45  ;;  %1951 = vrsqrt.f32 %v1252_v60 }
 0x39b   :  { %v1946_v39 = vpop.eup %1945  ;;  %1296 = vst [vmem:[#allocation3] sm:$0xff] %v1280_v30  ;;  %v1231_v27 = vpop.xlane.xlu1 %1230 }
 0x39c   :  { %v1948_v25 = vpop.eup %1947  ;;  %v1282_v19 = vmul.f32 %v1946_v39, %v2647_v24  ;;  %v1255_v3 = vmax.f32 %v1231_v27, 1e-24 }
 0x39d   :  { %v1283_v37 = vmul.f32 %v1948_v25, %v2639_v52 }
 0x39e   :  { %1298 = vst [vmem:[#allocation3 + $0x10] sm:$0xff] %v1282_v19  ;;  %1953 = vrsqrt.f32 %v1255_v3  ;;  %v1229_v15 = vpop.xlane.xlu0 %1228 }
 0x39f   :  { %1299 = vst [vmem:[#allocation3 + $0x18] sm:$0xff] %v1283_v37  ;;  %v1235_v6 = vpop.xlane.xlu1 %1234  ;;  %v1254_v29 = vmax.f32 %v1229_v15, 1e-24 }
 0x3a0   :  { %v1950_v40 = vpop.eup %1949  ;;  %v1257_v51 = vmax.f32 %v1235_v6, 1e-24 }
 0x3a1   :  { %v1285_v45 = vmul.f32 %v1950_v40, %v2669_v34 }
 0x3a2   :  { %1955 = vrsqrt.f32 %v1257_v51  ;;  %v1233_v59 = vpop.xlane.xlu0 %1232 }
 0x3a3   :  { %1301 = vst [vmem:[#allocation3 + $0x28] sm:$0xff] %v1285_v45  ;;  %1957 = vrsqrt.f32 %v1254_v29  ;;  %v1239_v56 = vpop.xlane.xlu1 %1238  ;;  %v1952_v58 = vpop.eup %1951  ;;  %v1256_v31 = vmax.f32 %v1233_v59, 1e-24 }
 0x3a4   :  { %v1259_v24 = vmax.f32 %v1239_v56, 1e-24  ;;  %v1284_v52 = vmul.f32 %v1952_v58, %v2687_v48 }
 0x3a6   :  { %1959 = vrsqrt.f32 %v1259_v24  ;;  %1300 = vst [vmem:[#allocation3 + $0x20] sm:$0xff] %v1284_v52 }
 0x3a7   :  { %1961 = vrsqrt.f32 %v1256_v31  ;;  %v1243_v7 = vpop.xlane.xlu1 %1242  ;;  %v1237_v43 = vpop.xlane.xlu0 %1236 }
 0x3a8   :  { %v1954_v2 = vpop.eup %1953  ;;  %v1261_v54 = vmax.f32 %v1243_v7, 1e-24  ;;  %v1258_v46 = vmax.f32 %v1237_v43, 1e-24 }
 0x3a9   :  { %v1287_v34 = vmul.f32 %v1954_v2, %v2715_v13 }
 0x3aa   :  { %1963 = vrsqrt.f32 %v1261_v54 }
 0x3ab   :  { %1303 = vst [vmem:[#allocation3 + $0x38] sm:$0xff] %v1287_v34  ;;  %1965 = vrsqrt.f32 %v1258_v46  ;;  %v1247_v23 = vpop.xlane.xlu1 %1246  ;;  %v1241_v32 = vpop.xlane.xlu0 %1240 }
 0x3ac   :  { %v1956_v21 = vpop.eup %1955  ;;  %v1263_v38 = vmax.f32 %v1247_v23, 1e-24  ;;  %v1260_v16 = vmax.f32 %v1241_v32, 1e-24 }
 0x3ad   :  { %v1958_v18 = vpop.eup %1957  ;;  %v1289_v48 = vmul.f32 %v1956_v21, %v2729_v50 }
 0x3ae   :  { %v1286_v36 = vmul.f32 %v1958_v18, %v2746_v1  ;;  %1967 = vrsqrt.f32 %v1263_v38 }
 0x3af   :  { %1305 = vst [vmem:[#allocation3 + $0x48] sm:$0xff] %v1289_v48  ;;  %1969 = vrsqrt.f32 %v1260_v16  ;;  %v1245_v47 = vpop.xlane.xlu0 %1244 }
 0x3b0   :  { %v1960_v17 = vpop.eup %1959  ;;  %1302 = vst [vmem:[#allocation3 + $0x30] sm:$0xff] %v1286_v36  ;;  %v1262_v13 = vmax.f32 %v1245_v47, 1e-24 }
 0x3b1   :  { %v1962_v22 = vpop.eup %1961  ;;  %v1291_v9 = vmul.f32 %v1960_v17, %v2762_v4 }
 0x3b2   :  { %v1288_v28 = vmul.f32 %v1962_v22, %v2773_v42  ;;  %1971 = vrsqrt.f32 %v1262_v13 }
 0x3b3   :  { %1307 = vst [vmem:[#allocation3 + $0x58] sm:$0xff] %v1291_v9 }
 0x3b4   :  { %v1964_v14 = vpop.eup %1963  ;;  %1304 = vst [vmem:[#allocation3 + $0x40] sm:$0xff] %v1288_v28 }
 0x3b5   :  { %v1966_v41 = vpop.eup %1965  ;;  %v1293_v50 = vmul.f32 %v1964_v14, %v2793_v61 }
 0x3b6   :  { %v1290_v1 = vmul.f32 %v1966_v41, %v2801_v0 }
 0x3b7   :  { %1309 = vst [vmem:[#allocation3 + $0x68] sm:$0xff] %v1293_v50 }
 0x3b8   :  { %v1968_v49 = vpop.eup %1967  ;;  %1306 = vst [vmem:[#allocation3 + $0x50] sm:$0xff] %v1290_v1 }
 0x3b9   :  { %v1970_v62 = vpop.eup %1969  ;;  %v1295_v63 = vmul.f32 %v1968_v49, %v2816_v53 }
 0x3ba   :  { %v1292_v55 = vmul.f32 %v1970_v62, %v2824_v44 }
 0x3bb   :  { %1311 = vst [vmem:[#allocation3 + $0x78] sm:$0xff] %v1295_v63 }
 0x3bc   :  { %v1972_v4 = vpop.eup %1971  ;;  %1308 = vst [vmem:[#allocation3 + $0x60] sm:$0xff] %v1292_v55 }
 0x3bd   :  { %v1294_v42 = vmul.f32 %v1972_v4, %v2832_v10 }
 0x3bf   :  { %1310 = vst [vmem:[#allocation3 + $0x70] sm:$0xff] %v1294_v42 }
 0x3c0   :  { %2006 = shalt.err (!%p2003_p12)
}
 0x3c1   :  { %s2007_s1 = scalar_lea.hbm %s2887_s11, 2048 }
 0x3c2   :  { %p2008_p13 = scmp.ne.s32.totalorder %s2887_s11, %s2007_s1  ;;  %p2011_p0 = scmp.lt.u32.totalorder %s2007_s1, %s2887_s11 }
 0x3c4   :  { %p2013_p1 = pnand %p2011_p0, %p2008_p13 }
 0x3c6   :  { %2016 = shalt.err (!%p2013_p1)
}
 0x3c7   :  { %s2024_s25 = smov 128   ;;  %s2025_s6 = smov 8  }
 0x3c8   :  { %1412 = dma.vmem_to_hbm [thread:$0]  %s1407_s17, 2048, %s2887_s11, [#allocation4], %s2024_s25, %s2024_s25, %s2025_s6  }
 0x3c9   :  { %2017 = dma.done.wait [#allocation4], 2048  }
 0x3ca   :  { %2018 = vsyncadd [#allocation4], 4294965248 }
 0x3cb   :  { %2019 = dma.done.wait [#allocation6], 16  }
 0x3cc   :  { %2020 = vsyncadd [#allocation6], 4294967280 }
 0x3cd   :  { %1429 = vsyncpa [#allocation4], 1 }
 0x3ce   :  { %1430 = vsyncpa [#allocation6], 1 }

</bundles_post_ra>
